<compile_context>
chip_gen: v7x
topology: tpu7x:2x2x1
jax: 0.10.0
libtpu: 0.0.40
codegen_flags: <defaults>
</compile_context>

<pallas_src>
import functools

import jax
import jax.numpy as jnp
from jax.experimental import pallas as pl
from jax.experimental.pallas import tpu as pltpu

NEG_SLOPE = 0.0   # nn.LeakyReLU(negative_slope=0.0)
BN_EPS = 1e-5     # PyTorch BatchNorm2d default eps
LPAD = 128        # left flat halo (lane-tile aligned so the h1 interior store
                  # lands at a 128-multiple lane offset -> unmasked stores)


def _act(x):
    if NEG_SLOPE == 0.0:
        return jnp.maximum(x, jnp.zeros_like(x))        # ReLU (no 0*(-inf) NaN)
    return jnp.maximum(x, NEG_SLOPE * x)                # LeakyReLU, 0 < slope <= 1


# ------------------------------ Pallas kernel ------------------------------

def basic_block_kernel(x_ref, mask_ref, w1t_ref, wdt_ref, w2t_ref,
                       scale1_ref, shift1_ref, scale2_ref, shift2_ref, bd_ref,
                       fc1w_ref, fc1b_ref, fc2w_ref, fc2b_ref, ws_ref, bs_ref,
                       o_ref, patch_ref, h1_ref, *, width, lpad):
    """Fused per-image forward in channels-leading flat layout.

    x_ref    : (Cin, LPAD + HW + W+1)  flat image with zero lane-halo
    mask_ref : (2, HW)   row 0: zero where w==0 ; row 1: zero where w==W-1
    w*t_ref  : (Cout, 9*C) prepacked conv weights (K order = (ky, kx, ci))
    o_ref    : (Cout, HW)
    patch_ref: (9*max(Cin,Cout), HW) VMEM im2col scratch (reused by both convs)
    h1_ref   : (Cout, LPAD + HW + W+1) VMEM scratch, conv1 activation + halo
    """
    Cin, _ = x_ref.shape
    Cout, HW = o_ref.shape
    W = width
    K1, K2 = 9 * Cin, 9 * Cout

    mask_l = mask_ref[0:1, :]   # kills reads that wrapped in from column -1
    mask_r = mask_ref[1:2, :]   # kills reads that wrapped in from column W

    def build_patch(src_ref, C):
        # src_ref: (C, LPAD + HW + W+1) flat activation with zero halo.
        # Tap (ky, kx) of a 3x3 / pad-1 conv is a static lane-slice at offset
        # lpad + (ky-1)*W + (kx-1); row under/overflow lands in the zero halo,
        # column wrap is zeroed by the two masks.
        for t in range(9):
            ky, kx = divmod(t, 3)
            start = lpad + (ky - 1) * W + (kx - 1)
            tap = src_ref[:, start:start + HW]                    # (C, HW)
            if kx == 0:
                tap = tap * mask_l
            elif kx == 2:
                tap = tap * mask_r
            patch_ref[t * C:(t + 1) * C, :] = tap

    # --- conv1 + downsample conv: one shared im2col patch, two K=9*Cin matmuls
    build_patch(x_ref, Cin)
    patch1 = patch_ref[0:K1, :]
    acc1 = jnp.dot(w1t_ref[...], patch1, preferred_element_type=jnp.float32)
    accd = jnp.dot(wdt_ref[...], patch1, preferred_element_type=jnp.float32)

    h1 = _act(acc1 * scale1_ref[...] + shift1_ref[...])      # bn1 + act, f32
    res = accd + bd_ref[...]                                  # downsample residual

    # --- keep h1 on-chip: zero only the halo strips (cheap, megacore-safe),
    #     interior is fully overwritten every step.
    h1_ref[:, 0:lpad] = jnp.zeros((Cout, lpad), h1_ref.dtype)
    h1_ref[:, lpad + HW:] = jnp.zeros(
        (Cout, h1_ref.shape[1] - lpad - HW), h1_ref.dtype)
    h1_ref[:, lpad:lpad + HW] = h1.astype(h1_ref.dtype)       # lane-aligned store

    # --- conv2 + bn2 + residual add: one K=9*Cout matmul ----------------------
    build_patch(h1_ref, Cout)
    acc2 = jnp.dot(w2t_ref[...], patch_ref[0:K2, :],
                   preferred_element_type=jnp.float32)
    out = acc2 * scale2_ref[...] + shift2_ref[...] + res      # (Cout, HW) f32

    # --- channel SE: spatial mean via MXU ones-matmul -> fc1 -> relu -> fc2 ---
    ones_col = jnp.full((HW, 1), 1.0 / HW, dtype=jnp.float32)
    sq = jnp.dot(out, ones_col, preferred_element_type=jnp.float32)      # (C,1)
    f1 = jnp.maximum(
        jnp.dot(fc1w_ref[...], sq, preferred_element_type=jnp.float32)
        + fc1b_ref[...], 0.0)
    gate_c = jax.nn.sigmoid(
        jnp.dot(fc2w_ref[...], f1, preferred_element_type=jnp.float32)
        + fc2b_ref[...])                                                  # (C,1)

    # --- spatial SE: 1x1 conv C->1 as an MXU matmul ---------------------------
    gate_s = jax.nn.sigmoid(
        jnp.dot(ws_ref[...], out, preferred_element_type=jnp.float32)
        + bs_ref[...])                                                    # (1,HW)

    m = jnp.maximum(out * gate_c, out * gate_s)
    o_ref[...] = _act(m).astype(o_ref.dtype)


# ------------------------------- JAX wrapper --------------------------------

def _fold_bn(gamma, beta, mean, var, conv_bias):
    # Eval-mode BatchNorm folded into per-channel scale/shift, column vectors.
    scale = (gamma / jnp.sqrt(var + BN_EPS)).astype(jnp.float32)
    shift = (beta + scale * (conv_bias - mean)).astype(jnp.float32)
    return scale.reshape(-1, 1), shift.reshape(-1, 1)


def basic_block_forward(x_nchw, p, compute_dtype=jnp.bfloat16, out_dtype=None):
    """NCHW in / NCHW out.  compute_dtype: matmul-operand dtype (bf16 on
    v6e/v7x, f32 for tight checks).  out_dtype: HBM output dtype."""
    N, Cin, H, W = x_nchw.shape
    Cout = p["w1"].shape[-1]
    HW = H * W
    RPAD = W + 1
    HWe = LPAD + HW + RPAD
    if out_dtype is None:
        out_dtype = jnp.float32

    # Layout glue: NO transposes.  Flatten spatial (free) + zero lane-halo pad.
    x_ext = jnp.pad(x_nchw.reshape(N, Cin, HW).astype(compute_dtype),
                    ((0, 0), (0, 0), (LPAD, RPAD)))

    # Column-boundary masks (exact 0/1 in any dtype).
    w_idx = jnp.arange(HW, dtype=jnp.int32) % W
    masks = jnp.stack([(w_idx != 0), (w_idx != W - 1)]).astype(compute_dtype)

    # Conv weights prepacked as (Cout, 9*C) with K order (ky, kx, ci).
    w1t = p["w1"].reshape(9 * Cin, Cout).T.astype(compute_dtype)
    wdt = p["wd"].reshape(9 * Cin, Cout).T.astype(compute_dtype)
    w2t = p["w2"].reshape(9 * Cout, Cout).T.astype(compute_dtype)

    scale1, shift1 = _fold_bn(p["bn1_gamma"], p["bn1_beta"],
                              p["bn1_mean"], p["bn1_var"], p["b1"])
    scale2, shift2 = _fold_bn(p["bn2_gamma"], p["bn2_beta"],
                              p["bn2_mean"], p["bn2_var"], p["b2"])
    bd = p["bd"].reshape(Cout, 1).astype(jnp.float32)
    fc1w = p["fc1_w"].T.astype(jnp.float32)            # (Cred, C)
    fc1b = p["fc1_b"].reshape(-1, 1).astype(jnp.float32)
    fc2w = p["fc2_w"].T.astype(jnp.float32)            # (C, Cred)
    fc2b = p["fc2_b"].reshape(Cout, 1).astype(jnp.float32)
    ws = p["sse_w"].reshape(1, Cout).astype(jnp.float32)
    bs = p["sse_b"].reshape(1, 1).astype(jnp.float32)

    def rep(arr):
        nd = arr.ndim
        return pl.BlockSpec(arr.shape, lambda n, _nd=nd: (0,) * _nd)

    kernel = functools.partial(basic_block_kernel, width=W, lpad=LPAD)

    out = pl.pallas_call(
        kernel,
        out_shape=jax.ShapeDtypeStruct((N, Cout, HW), out_dtype),
        grid=(N,),
        in_specs=[
            pl.BlockSpec((None, Cin, HWe), lambda n: (n, 0, 0)),   # x_ext
            rep(masks), rep(w1t), rep(wdt), rep(w2t),
            rep(scale1), rep(shift1), rep(scale2), rep(shift2), rep(bd),
            rep(fc1w), rep(fc1b), rep(fc2w), rep(fc2b), rep(ws), rep(bs),
        ],
        out_specs=pl.BlockSpec((None, Cout, HW), lambda n: (n, 0, 0)),
        scratch_shapes=[
            pltpu.VMEM((9 * max(Cin, Cout), HW), compute_dtype),   # im2col patch
            pltpu.VMEM((Cout, HWe), compute_dtype),                # h1 + halo
        ],
        compiler_params=pltpu.CompilerParams(
            dimension_semantics=("parallel",),        # batch is independent
            vmem_limit_bytes=32 * 1024 * 1024,        # tiny footprint; fits all gens
        ),
    )(x_ext, masks, w1t, wdt, w2t, scale1, shift1, scale2, shift2, bd,
      fc1w, fc1b, fc2w, fc2b, ws, bs)

    return out.reshape(N, Cout, H, W)                 # free row-major reshape


# ----------------------- deterministic parameter init -----------------------

def init_params(key, in_ch, out_ch):
    ks = jax.random.split(key, 20)

    def nrm(k, shape, scale=0.1):
        return scale * jax.random.normal(k, shape, dtype=jnp.float32)

    return {
        "w1": nrm(ks[0], (3, 3, in_ch, out_ch)),
        "b1": nrm(ks[1], (out_ch,)),
        "w2": nrm(ks[2], (3, 3, out_ch, out_ch)),
        "b2": nrm(ks[3], (out_ch,)),
        "wd": nrm(ks[4], (3, 3, in_ch, out_ch)),      # downsample_func conv
        "bd": nrm(ks[5], (out_ch,)),
        "bn1_gamma": 1.0 + nrm(ks[6], (out_ch,)),
        "bn1_beta": nrm(ks[7], (out_ch,)),
        "bn1_mean": nrm(ks[8], (out_ch,)),
        "bn1_var": 1.0 + jnp.abs(nrm(ks[9], (out_ch,))),
        "bn2_gamma": 1.0 + nrm(ks[10], (out_ch,)),
        "bn2_beta": nrm(ks[11], (out_ch,)),
        "bn2_mean": nrm(ks[12], (out_ch,)),
        "bn2_var": 1.0 + jnp.abs(nrm(ks[13], (out_ch,))),
        "fc1_w": nrm(ks[14], (out_ch, out_ch), 0.3),  # reduction_ratio=1 -> C x C
        "fc1_b": nrm(ks[15], (out_ch,)),
        "fc2_w": nrm(ks[16], (out_ch, out_ch), 0.3),
        "fc2_b": nrm(ks[17], (out_ch,)),
        "sse_w": nrm(ks[18], (out_ch,), 0.3),         # 1x1 conv C->1
        "sse_b": nrm(ks[19], ()),
    }


# ------------------------------ pure-JAX reference ---------------------------

def reference_forward(x_nchw, p):
    x = jnp.transpose(x_nchw, (0, 2, 3, 1)).astype(jnp.float32)
    hi = jax.lax.Precision.HIGHEST

    def conv3x3(inp, w, b):
        return jax.lax.conv_general_dilated(
            inp, w, window_strides=(1, 1), padding=((1, 1), (1, 1)),
            dimension_numbers=("NHWC", "HWIO", "NHWC"), precision=hi) + b

    def bn(h, g, be, m, v):
        return (h - m) / jnp.sqrt(v + BN_EPS) * g + be

    h = _act(bn(conv3x3(x, p["w1"], p["b1"]),
                p["bn1_gamma"], p["bn1_beta"], p["bn1_mean"], p["bn1_var"]))
    h = bn(conv3x3(h, p["w2"], p["b2"]),
           p["bn2_gamma"], p["bn2_beta"], p["bn2_mean"], p["bn2_var"])
    out = h + conv3x3(x, p["wd"], p["bd"])
    # cSE
    sq = out.mean(axis=(1, 2))                                    # (N, C)
    f1 = jnp.maximum(jnp.dot(sq, p["fc1_w"], precision=hi) + p["fc1_b"], 0.0)
    gc = jax.nn.sigmoid(jnp.dot(f1, p["fc2_w"], precision=hi) + p["fc2_b"])
    cse = out * gc[:, None, None, :]
    # sSE
    gs = jax.nn.sigmoid(
        jnp.einsum("nhwc,c->nhw", out, p["sse_w"], precision=hi)[..., None]
        + p["sse_b"])
    sse = out * gs
    return jnp.transpose(_act(jnp.maximum(cse, sse)), (0, 3, 1, 2))


if __name__ == "__main__":
    key = jax.random.PRNGKey(0)
    kx, kp = jax.random.split(key)
    N, Cin, H, W = 2, 4, 16, 16
    Cout = 4          # in_channels=4, out_channels=4, stride=1, kernel=3, pad=1

    x = jax.random.normal(kx, (N, Cin, H, W), dtype=jnp.float32)
    params = init_params(kp, Cin, Cout)

    y_ref = reference_forward(x, params)

    # f32 matmul path + f32 output: tight correctness check.
    y32 = jax.block_until_ready(
        basic_block_forward(x, params, compute_dtype=jnp.float32,
                            out_dtype=jnp.float32))
    assert y32.shape == (N, Cout, H, W), y32.shape
    err32 = float(jnp.max(jnp.abs(y32 - y_ref)))
    assert err32 < 1e-4, f"f32 max abs err too large: {err32}"

    # bf16 matmul operands + bf16 output (recommended on v6e/v7x): looser tol.
    ybf = jax.block_until_ready(
        basic_block_forward(x, params, compute_dtype=jnp.bfloat16,
                            out_dtype=jnp.bfloat16))
    errbf = float(jnp.max(jnp.abs(ybf.astype(jnp.float32) - y_ref)))
    assert errbf < 7.5e-2, f"bf16 max abs err too large: {errbf}"

    print("KERNEL_OK")
</pallas_src>

<mosaic_0001>
module attributes {stable_mosaic.version = 11 : i64} {
  func.func @basic_block_kernel(%arg0: i32, %arg1: memref<1x4x401xf32, #tpu.memory_space<vmem>>, %arg2: memref<2x256xf32, #tpu.memory_space<vmem>>, %arg3: memref<4x36xf32, #tpu.memory_space<vmem>>, %arg4: memref<4x36xf32, #tpu.memory_space<vmem>>, %arg5: memref<4x36xf32, #tpu.memory_space<vmem>>, %arg6: memref<4x1xf32, #tpu.memory_space<vmem>>, %arg7: memref<4x1xf32, #tpu.memory_space<vmem>>, %arg8: memref<4x1xf32, #tpu.memory_space<vmem>>, %arg9: memref<4x1xf32, #tpu.memory_space<vmem>>, %arg10: memref<4x1xf32, #tpu.memory_space<vmem>>, %arg11: memref<4x4xf32, #tpu.memory_space<vmem>>, %arg12: memref<4x1xf32, #tpu.memory_space<vmem>>, %arg13: memref<4x4xf32, #tpu.memory_space<vmem>>, %arg14: memref<4x1xf32, #tpu.memory_space<vmem>>, %arg15: memref<1x4xf32, #tpu.memory_space<vmem>>, %arg16: memref<1x1xf32, #tpu.memory_space<vmem>>, %arg17: memref<1x4x256xf32, #tpu.memory_space<vmem>>, %arg18: memref<36x256xf32, #tpu.memory_space<vmem>>, %arg19: memref<4x401xf32, #tpu.memory_space<vmem>>) attributes {dimension_semantics = [#tpu.dimension_semantics<parallel>], iteration_bounds = array<i64: 2>, scalar_prefetch = 0 : i64, scratch_operands = 2 : i64, tpu.core_type = #tpu.core_type<tc>, window_params = [{transform_indices = @transform_0, window_bounds = array<i64: 1, 4, 401>}, {pipeline_mode = #tpu.pipeline_mode<synchronous>, transform_indices = @transform_1, window_bounds = array<i64: 2, 256>}, {pipeline_mode = #tpu.pipeline_mode<synchronous>, transform_indices = @transform_2, window_bounds = array<i64: 4, 36>}, {pipeline_mode = #tpu.pipeline_mode<synchronous>, transform_indices = @transform_3, window_bounds = array<i64: 4, 36>}, {pipeline_mode = #tpu.pipeline_mode<synchronous>, transform_indices = @transform_4, window_bounds = array<i64: 4, 36>}, {pipeline_mode = #tpu.pipeline_mode<synchronous>, transform_indices = @transform_5, window_bounds = array<i64: 4, 1>}, {pipeline_mode = #tpu.pipeline_mode<synchronous>, transform_indices = @transform_6, window_bounds = array<i64: 4, 1>}, {pipeline_mode = #tpu.pipeline_mode<synchronous>, transform_indices = @transform_7, window_bounds = array<i64: 4, 1>}, {pipeline_mode = #tpu.pipeline_mode<synchronous>, transform_indices = @transform_8, window_bounds = array<i64: 4, 1>}, {pipeline_mode = #tpu.pipeline_mode<synchronous>, transform_indices = @transform_9, window_bounds = array<i64: 4, 1>}, {pipeline_mode = #tpu.pipeline_mode<synchronous>, transform_indices = @transform_10, window_bounds = array<i64: 4, 4>}, {pipeline_mode = #tpu.pipeline_mode<synchronous>, transform_indices = @transform_11, window_bounds = array<i64: 4, 1>}, {pipeline_mode = #tpu.pipeline_mode<synchronous>, transform_indices = @transform_12, window_bounds = array<i64: 4, 4>}, {pipeline_mode = #tpu.pipeline_mode<synchronous>, transform_indices = @transform_13, window_bounds = array<i64: 4, 1>}, {pipeline_mode = #tpu.pipeline_mode<synchronous>, transform_indices = @transform_14, window_bounds = array<i64: 1, 4>}, {pipeline_mode = #tpu.pipeline_mode<synchronous>, transform_indices = @transform_15, window_bounds = array<i64: 1, 1>}, {transform_indices = @transform_16, window_bounds = array<i64: 1, 4, 256>}]} {
    %c0 = arith.constant 0 : index
    %c0_0 = arith.constant 0 : index
    %0 = vector.load %arg2[%c0, %c0_0] : memref<2x256xf32, #tpu.memory_space<vmem>>, vector<1x256xf32>
    %c1 = arith.constant 1 : index
    %c0_1 = arith.constant 0 : index
    %1 = vector.load %arg2[%c1, %c0_1] : memref<2x256xf32, #tpu.memory_space<vmem>>, vector<1x256xf32>
    %c0_2 = arith.constant 0 : index
    %c0_3 = arith.constant 0 : index
    %c111 = arith.constant 111 : index
    %2 = vector.load %arg1[%c0_2, %c0_3, %c111] : memref<1x4x401xf32, #tpu.memory_space<vmem>>, vector<1x4x256xf32>
    %3 = vector.shape_cast %2 : vector<1x4x256xf32> to vector<4x256xf32>
    %4 = vector.broadcast %0 : vector<1x256xf32> to vector<4x256xf32>
    %5 = arith.mulf %3, %4 : vector<4x256xf32>
    %c0_4 = arith.constant 0 : index
    %c0_5 = arith.constant 0 : index
    %6 = vector.load %arg18[%c0_4, %c0_5] : memref<36x256xf32, #tpu.memory_space<vmem>>, vector<4x256xf32>
    tpu.vector_store %arg18[%c0_4, %c0_5], %5 {strides = array<i32>} : memref<36x256xf32, #tpu.memory_space<vmem>>, vector<4x256xf32>,
    %c0_6 = arith.constant 0 : index
    %c0_7 = arith.constant 0 : index
    %c112 = arith.constant 112 : index
    %7 = vector.load %arg1[%c0_6, %c0_7, %c112] : memref<1x4x401xf32, #tpu.memory_space<vmem>>, vector<1x4x256xf32>
    %8 = vector.shape_cast %7 : vector<1x4x256xf32> to vector<4x256xf32>
    %c4 = arith.constant 4 : index
    %c0_8 = arith.constant 0 : index
    %9 = vector.load %arg18[%c4, %c0_8] : memref<36x256xf32, #tpu.memory_space<vmem>>, vector<4x256xf32>
    tpu.vector_store %arg18[%c4, %c0_8], %8 {strides = array<i32>} : memref<36x256xf32, #tpu.memory_space<vmem>>, vector<4x256xf32>,
    %c0_9 = arith.constant 0 : index
    %c0_10 = arith.constant 0 : index
    %c113 = arith.constant 113 : index
    %10 = vector.load %arg1[%c0_9, %c0_10, %c113] : memref<1x4x401xf32, #tpu.memory_space<vmem>>, vector<1x4x256xf32>
    %11 = vector.shape_cast %10 : vector<1x4x256xf32> to vector<4x256xf32>
    %12 = vector.broadcast %1 : vector<1x256xf32> to vector<4x256xf32>
    %13 = arith.mulf %11, %12 : vector<4x256xf32>
    %c8 = arith.constant 8 : index
    %c0_11 = arith.constant 0 : index
    %14 = vector.load %arg18[%c8, %c0_11] : memref<36x256xf32, #tpu.memory_space<vmem>>, vector<4x256xf32>
    tpu.vector_store %arg18[%c8, %c0_11], %13 {strides = array<i32>} : memref<36x256xf32, #tpu.memory_space<vmem>>, vector<4x256xf32>,
    %c0_12 = arith.constant 0 : index
    %c0_13 = arith.constant 0 : index
    %c127 = arith.constant 127 : index
    %15 = vector.load %arg1[%c0_12, %c0_13, %c127] : memref<1x4x401xf32, #tpu.memory_space<vmem>>, vector<1x4x256xf32>
    %16 = vector.shape_cast %15 : vector<1x4x256xf32> to vector<4x256xf32>
    %17 = vector.broadcast %0 : vector<1x256xf32> to vector<4x256xf32>
    %18 = arith.mulf %16, %17 : vector<4x256xf32>
    %c12 = arith.constant 12 : index
    %c0_14 = arith.constant 0 : index
    %19 = vector.load %arg18[%c12, %c0_14] : memref<36x256xf32, #tpu.memory_space<vmem>>, vector<4x256xf32>
    tpu.vector_store %arg18[%c12, %c0_14], %18 {strides = array<i32>} : memref<36x256xf32, #tpu.memory_space<vmem>>, vector<4x256xf32>,
    %c0_15 = arith.constant 0 : index
    %c0_16 = arith.constant 0 : index
    %c128 = arith.constant 128 : index
    %20 = vector.load %arg1[%c0_15, %c0_16, %c128] : memref<1x4x401xf32, #tpu.memory_space<vmem>>, vector<1x4x256xf32>
    %21 = vector.shape_cast %20 : vector<1x4x256xf32> to vector<4x256xf32>
    %c16 = arith.constant 16 : index
    %c0_17 = arith.constant 0 : index
    %22 = vector.load %arg18[%c16, %c0_17] : memref<36x256xf32, #tpu.memory_space<vmem>>, vector<4x256xf32>
    tpu.vector_store %arg18[%c16, %c0_17], %21 {strides = array<i32>} : memref<36x256xf32, #tpu.memory_space<vmem>>, vector<4x256xf32>,
    %c0_18 = arith.constant 0 : index
    %c0_19 = arith.constant 0 : index
    %c129 = arith.constant 129 : index
    %23 = vector.load %arg1[%c0_18, %c0_19, %c129] : memref<1x4x401xf32, #tpu.memory_space<vmem>>, vector<1x4x256xf32>
    %24 = vector.shape_cast %23 : vector<1x4x256xf32> to vector<4x256xf32>
    %25 = vector.broadcast %1 : vector<1x256xf32> to vector<4x256xf32>
    %26 = arith.mulf %24, %25 : vector<4x256xf32>
    %c20 = arith.constant 20 : index
    %c0_20 = arith.constant 0 : index
    %27 = vector.load %arg18[%c20, %c0_20] : memref<36x256xf32, #tpu.memory_space<vmem>>, vector<4x256xf32>
    tpu.vector_store %arg18[%c20, %c0_20], %26 {strides = array<i32>} : memref<36x256xf32, #tpu.memory_space<vmem>>, vector<4x256xf32>,
    %c0_21 = arith.constant 0 : index
    %c0_22 = arith.constant 0 : index
    %c143 = arith.constant 143 : index
    %28 = vector.load %arg1[%c0_21, %c0_22, %c143] : memref<1x4x401xf32, #tpu.memory_space<vmem>>, vector<1x4x256xf32>
    %29 = vector.shape_cast %28 : vector<1x4x256xf32> to vector<4x256xf32>
    %30 = vector.broadcast %0 : vector<1x256xf32> to vector<4x256xf32>
    %31 = arith.mulf %29, %30 : vector<4x256xf32>
    %c24 = arith.constant 24 : index
    %c0_23 = arith.constant 0 : index
    %32 = vector.load %arg18[%c24, %c0_23] : memref<36x256xf32, #tpu.memory_space<vmem>>, vector<4x256xf32>
    tpu.vector_store %arg18[%c24, %c0_23], %31 {strides = array<i32>} : memref<36x256xf32, #tpu.memory_space<vmem>>, vector<4x256xf32>,
    %c0_24 = arith.constant 0 : index
    %c0_25 = arith.constant 0 : index
    %c144 = arith.constant 144 : index
    %33 = vector.load %arg1[%c0_24, %c0_25, %c144] : memref<1x4x401xf32, #tpu.memory_space<vmem>>, vector<1x4x256xf32>
    %34 = vector.shape_cast %33 : vector<1x4x256xf32> to vector<4x256xf32>
    %c28 = arith.constant 28 : index
    %c0_26 = arith.constant 0 : index
    %35 = vector.load %arg18[%c28, %c0_26] : memref<36x256xf32, #tpu.memory_space<vmem>>, vector<4x256xf32>
    tpu.vector_store %arg18[%c28, %c0_26], %34 {strides = array<i32>} : memref<36x256xf32, #tpu.memory_space<vmem>>, vector<4x256xf32>,
    %c0_27 = arith.constant 0 : index
    %c0_28 = arith.constant 0 : index
    %c145 = arith.constant 145 : index
    %36 = vector.load %arg1[%c0_27, %c0_28, %c145] : memref<1x4x401xf32, #tpu.memory_space<vmem>>, vector<1x4x256xf32>
    %37 = vector.shape_cast %36 : vector<1x4x256xf32> to vector<4x256xf32>
    %38 = vector.broadcast %1 : vector<1x256xf32> to vector<4x256xf32>
    %39 = arith.mulf %37, %38 : vector<4x256xf32>
    %c32 = arith.constant 32 : index
    %c0_29 = arith.constant 0 : index
    %40 = vector.load %arg18[%c32, %c0_29] : memref<36x256xf32, #tpu.memory_space<vmem>>, vector<4x256xf32>
    tpu.vector_store %arg18[%c32, %c0_29], %39 {strides = array<i32>} : memref<36x256xf32, #tpu.memory_space<vmem>>, vector<4x256xf32>,
    %c0_30 = arith.constant 0 : index
    %c0_31 = arith.constant 0 : index
    %41 = vector.load %arg18[%c0_30, %c0_31] : memref<36x256xf32, #tpu.memory_space<vmem>>, vector<36x256xf32>
    %c0_32 = arith.constant 0 : index
    %c0_33 = arith.constant 0 : index
    %42 = vector.load %arg3[%c0_32, %c0_33] : memref<4x36xf32, #tpu.memory_space<vmem>>, vector<4x36xf32>
    %cst = arith.constant dense<0.000000e+00> : vector<4x256xf32>
    %43 = tpu.matmul %42, %41, %cst {dimension_numbers = #tpu.dot_dimension_numbers<[1], [0], [0], [1], [0, 0, 1, 1], [], []>} : vector<4x36xf32>, vector<36x256xf32>, vector<4x256xf32> -> vector<4x256xf32>
    %c0_34 = arith.constant 0 : index
    %c0_35 = arith.constant 0 : index
    %44 = vector.load %arg4[%c0_34, %c0_35] : memref<4x36xf32, #tpu.memory_space<vmem>>, vector<4x36xf32>
    %cst_36 = arith.constant dense<0.000000e+00> : vector<4x256xf32>
    %45 = tpu.matmul %44, %41, %cst_36 {dimension_numbers = #tpu.dot_dimension_numbers<[1], [0], [0], [1], [0, 0, 1, 1], [], []>} : vector<4x36xf32>, vector<36x256xf32>, vector<4x256xf32> -> vector<4x256xf32>
    %c0_37 = arith.constant 0 : index
    %c0_38 = arith.constant 0 : index
    %46 = vector.load %arg6[%c0_37, %c0_38] : memref<4x1xf32, #tpu.memory_space<vmem>>, vector<4x1xf32>
    %47 = vector.broadcast %46 : vector<4x1xf32> to vector<4x256xf32>
    %48 = arith.mulf %43, %47 : vector<4x256xf32>
    %c0_39 = arith.constant 0 : index
    %c0_40 = arith.constant 0 : index
    %49 = vector.load %arg7[%c0_39, %c0_40] : memref<4x1xf32, #tpu.memory_space<vmem>>, vector<4x1xf32>
    %50 = vector.broadcast %49 : vector<4x1xf32> to vector<4x256xf32>
    %51 = arith.addf %48, %50 : vector<4x256xf32>
    %cst_41 = arith.constant 0.000000e+00 : f32
    %52 = vector.broadcast %cst_41 : f32 to vector<4x256xf32>
    %53 = arith.maximumf %51, %52 : vector<4x256xf32>
    %c0_42 = arith.constant 0 : index
    %c0_43 = arith.constant 0 : index
    %54 = vector.load %arg10[%c0_42, %c0_43] : memref<4x1xf32, #tpu.memory_space<vmem>>, vector<4x1xf32>
    %55 = vector.broadcast %54 : vector<4x1xf32> to vector<4x256xf32>
    %56 = arith.addf %45, %55 : vector<4x256xf32>
    %cst_44 = arith.constant 0.000000e+00 : f32
    %57 = vector.broadcast %cst_44 : f32 to vector<4x128xf32>
    %c0_45 = arith.constant 0 : index
    %c0_46 = arith.constant 0 : index
    %58 = vector.load %arg19[%c0_45, %c0_46] : memref<4x401xf32, #tpu.memory_space<vmem>>, vector<4x128xf32>
    tpu.vector_store %arg19[%c0_45, %c0_46], %57 {strides = array<i32>} : memref<4x401xf32, #tpu.memory_space<vmem>>, vector<4x128xf32>,
    %cst_47 = arith.constant 0.000000e+00 : f32
    %59 = vector.broadcast %cst_47 : f32 to vector<4x17xf32>
    %c0_48 = arith.constant 0 : index
    %c384 = arith.constant 384 : index
    %60 = vector.load %arg19[%c0_48, %c384] : memref<4x401xf32, #tpu.memory_space<vmem>>, vector<4x17xf32>
    tpu.vector_store %arg19[%c0_48, %c384], %59 {strides = array<i32>} : memref<4x401xf32, #tpu.memory_space<vmem>>, vector<4x17xf32>,
    %c0_49 = arith.constant 0 : index
    %c128_50 = arith.constant 128 : index
    %61 = vector.load %arg19[%c0_49, %c128_50] : memref<4x401xf32, #tpu.memory_space<vmem>>, vector<4x256xf32>
    tpu.vector_store %arg19[%c0_49, %c128_50], %53 {strides = array<i32>} : memref<4x401xf32, #tpu.memory_space<vmem>>, vector<4x256xf32>,
    %c0_51 = arith.constant 0 : index
    %c111_52 = arith.constant 111 : index
    %62 = vector.load %arg19[%c0_51, %c111_52] : memref<4x401xf32, #tpu.memory_space<vmem>>, vector<4x256xf32>
    %63 = vector.broadcast %0 : vector<1x256xf32> to vector<4x256xf32>
    %64 = arith.mulf %62, %63 : vector<4x256xf32>
    %c0_53 = arith.constant 0 : index
    %c0_54 = arith.constant 0 : index
    %65 = vector.load %arg18[%c0_53, %c0_54] : memref<36x256xf32, #tpu.memory_space<vmem>>, vector<4x256xf32>
    tpu.vector_store %arg18[%c0_53, %c0_54], %64 {strides = array<i32>} : memref<36x256xf32, #tpu.memory_space<vmem>>, vector<4x256xf32>,
    %c0_55 = arith.constant 0 : index
    %c112_56 = arith.constant 112 : index
    %66 = vector.load %arg19[%c0_55, %c112_56] : memref<4x401xf32, #tpu.memory_space<vmem>>, vector<4x256xf32>
    %c4_57 = arith.constant 4 : index
    %c0_58 = arith.constant 0 : index
    %67 = vector.load %arg18[%c4_57, %c0_58] : memref<36x256xf32, #tpu.memory_space<vmem>>, vector<4x256xf32>
    tpu.vector_store %arg18[%c4_57, %c0_58], %66 {strides = array<i32>} : memref<36x256xf32, #tpu.memory_space<vmem>>, vector<4x256xf32>,
    %c0_59 = arith.constant 0 : index
    %c113_60 = arith.constant 113 : index
    %68 = vector.load %arg19[%c0_59, %c113_60] : memref<4x401xf32, #tpu.memory_space<vmem>>, vector<4x256xf32>
    %69 = vector.broadcast %1 : vector<1x256xf32> to vector<4x256xf32>
    %70 = arith.mulf %68, %69 : vector<4x256xf32>
    %c8_61 = arith.constant 8 : index
    %c0_62 = arith.constant 0 : index
    %71 = vector.load %arg18[%c8_61, %c0_62] : memref<36x256xf32, #tpu.memory_space<vmem>>, vector<4x256xf32>
    tpu.vector_store %arg18[%c8_61, %c0_62], %70 {strides = array<i32>} : memref<36x256xf32, #tpu.memory_space<vmem>>, vector<4x256xf32>,
    %c0_63 = arith.constant 0 : index
    %c127_64 = arith.constant 127 : index
    %72 = vector.load %arg19[%c0_63, %c127_64] : memref<4x401xf32, #tpu.memory_space<vmem>>, vector<4x256xf32>
    %73 = vector.broadcast %0 : vector<1x256xf32> to vector<4x256xf32>
    %74 = arith.mulf %72, %73 : vector<4x256xf32>
    %c12_65 = arith.constant 12 : index
    %c0_66 = arith.constant 0 : index
    %75 = vector.load %arg18[%c12_65, %c0_66] : memref<36x256xf32, #tpu.memory_space<vmem>>, vector<4x256xf32>
    tpu.vector_store %arg18[%c12_65, %c0_66], %74 {strides = array<i32>} : memref<36x256xf32, #tpu.memory_space<vmem>>, vector<4x256xf32>,
    %c0_67 = arith.constant 0 : index
    %c128_68 = arith.constant 128 : index
    %76 = vector.load %arg19[%c0_67, %c128_68] : memref<4x401xf32, #tpu.memory_space<vmem>>, vector<4x256xf32>
    %c16_69 = arith.constant 16 : index
    %c0_70 = arith.constant 0 : index
    %77 = vector.load %arg18[%c16_69, %c0_70] : memref<36x256xf32, #tpu.memory_space<vmem>>, vector<4x256xf32>
    tpu.vector_store %arg18[%c16_69, %c0_70], %76 {strides = array<i32>} : memref<36x256xf32, #tpu.memory_space<vmem>>, vector<4x256xf32>,
    %c0_71 = arith.constant 0 : index
    %c129_72 = arith.constant 129 : index
    %78 = vector.load %arg19[%c0_71, %c129_72] : memref<4x401xf32, #tpu.memory_space<vmem>>, vector<4x256xf32>
    %79 = vector.broadcast %1 : vector<1x256xf32> to vector<4x256xf32>
    %80 = arith.mulf %78, %79 : vector<4x256xf32>
    %c20_73 = arith.constant 20 : index
    %c0_74 = arith.constant 0 : index
    %81 = vector.load %arg18[%c20_73, %c0_74] : memref<36x256xf32, #tpu.memory_space<vmem>>, vector<4x256xf32>
    tpu.vector_store %arg18[%c20_73, %c0_74], %80 {strides = array<i32>} : memref<36x256xf32, #tpu.memory_space<vmem>>, vector<4x256xf32>,
    %c0_75 = arith.constant 0 : index
    %c143_76 = arith.constant 143 : index
    %82 = vector.load %arg19[%c0_75, %c143_76] : memref<4x401xf32, #tpu.memory_space<vmem>>, vector<4x256xf32>
    %83 = vector.broadcast %0 : vector<1x256xf32> to vector<4x256xf32>
    %84 = arith.mulf %82, %83 : vector<4x256xf32>
    %c24_77 = arith.constant 24 : index
    %c0_78 = arith.constant 0 : index
    %85 = vector.load %arg18[%c24_77, %c0_78] : memref<36x256xf32, #tpu.memory_space<vmem>>, vector<4x256xf32>
    tpu.vector_store %arg18[%c24_77, %c0_78], %84 {strides = array<i32>} : memref<36x256xf32, #tpu.memory_space<vmem>>, vector<4x256xf32>,
    %c0_79 = arith.constant 0 : index
    %c144_80 = arith.constant 144 : index
    %86 = vector.load %arg19[%c0_79, %c144_80] : memref<4x401xf32, #tpu.memory_space<vmem>>, vector<4x256xf32>
    %c28_81 = arith.constant 28 : index
    %c0_82 = arith.constant 0 : index
    %87 = vector.load %arg18[%c28_81, %c0_82] : memref<36x256xf32, #tpu.memory_space<vmem>>, vector<4x256xf32>
    tpu.vector_store %arg18[%c28_81, %c0_82], %86 {strides = array<i32>} : memref<36x256xf32, #tpu.memory_space<vmem>>, vector<4x256xf32>,
    %c0_83 = arith.constant 0 : index
    %c145_84 = arith.constant 145 : index
    %88 = vector.load %arg19[%c0_83, %c145_84] : memref<4x401xf32, #tpu.memory_space<vmem>>, vector<4x256xf32>
    %89 = vector.broadcast %1 : vector<1x256xf32> to vector<4x256xf32>
    %90 = arith.mulf %88, %89 : vector<4x256xf32>
    %c32_85 = arith.constant 32 : index
    %c0_86 = arith.constant 0 : index
    %91 = vector.load %arg18[%c32_85, %c0_86] : memref<36x256xf32, #tpu.memory_space<vmem>>, vector<4x256xf32>
    tpu.vector_store %arg18[%c32_85, %c0_86], %90 {strides = array<i32>} : memref<36x256xf32, #tpu.memory_space<vmem>>, vector<4x256xf32>,
    %c0_87 = arith.constant 0 : index
    %c0_88 = arith.constant 0 : index
    %92 = vector.load %arg5[%c0_87, %c0_88] : memref<4x36xf32, #tpu.memory_space<vmem>>, vector<4x36xf32>
    %c0_89 = arith.constant 0 : index
    %c0_90 = arith.constant 0 : index
    %93 = vector.load %arg18[%c0_89, %c0_90] : memref<36x256xf32, #tpu.memory_space<vmem>>, vector<36x256xf32>
    %cst_91 = arith.constant dense<0.000000e+00> : vector<4x256xf32>
    %94 = tpu.matmul %92, %93, %cst_91 {dimension_numbers = #tpu.dot_dimension_numbers<[1], [0], [0], [1], [0, 0, 1, 1], [], []>} : vector<4x36xf32>, vector<36x256xf32>, vector<4x256xf32> -> vector<4x256xf32>
    %c0_92 = arith.constant 0 : index
    %c0_93 = arith.constant 0 : index
    %95 = vector.load %arg8[%c0_92, %c0_93] : memref<4x1xf32, #tpu.memory_space<vmem>>, vector<4x1xf32>
    %96 = vector.broadcast %95 : vector<4x1xf32> to vector<4x256xf32>
    %97 = arith.mulf %94, %96 : vector<4x256xf32>
    %c0_94 = arith.constant 0 : index
    %c0_95 = arith.constant 0 : index
    %98 = vector.load %arg9[%c0_94, %c0_95] : memref<4x1xf32, #tpu.memory_space<vmem>>, vector<4x1xf32>
    %99 = vector.broadcast %98 : vector<4x1xf32> to vector<4x256xf32>
    %100 = arith.addf %97, %99 : vector<4x256xf32>
    %101 = arith.addf %100, %56 : vector<4x256xf32>
    %cst_96 = arith.constant 3.906250e-03 : f32
    %102 = vector.broadcast %cst_96 : f32 to vector<256x1xf32>
    %cst_97 = arith.constant dense<0.000000e+00> : vector<4x1xf32>
    %103 = tpu.matmul %101, %102, %cst_97 {dimension_numbers = #tpu.dot_dimension_numbers<[1], [0], [0], [1], [0, 0, 1, 1], [], []>} : vector<4x256xf32>, vector<256x1xf32>, vector<4x1xf32> -> vector<4x1xf32>
    %c0_98 = arith.constant 0 : index
    %c0_99 = arith.constant 0 : index
    %104 = vector.load %arg11[%c0_98, %c0_99] : memref<4x4xf32, #tpu.memory_space<vmem>>, vector<4x4xf32>
    %cst_100 = arith.constant dense<0.000000e+00> : vector<4x1xf32>
    %105 = tpu.matmul %104, %103, %cst_100 {dimension_numbers = #tpu.dot_dimension_numbers<[1], [0], [0], [1], [0, 0, 1, 1], [], []>} : vector<4x4xf32>, vector<4x1xf32>, vector<4x1xf32> -> vector<4x1xf32>
    %c0_101 = arith.constant 0 : index
    %c0_102 = arith.constant 0 : index
    %106 = vector.load %arg12[%c0_101, %c0_102] : memref<4x1xf32, #tpu.memory_space<vmem>>, vector<4x1xf32>
    %107 = arith.addf %105, %106 : vector<4x1xf32>
    %cst_103 = arith.constant 0.000000e+00 : f32
    %108 = vector.broadcast %cst_103 : f32 to vector<4x1xf32>
    %109 = arith.maximumf %107, %108 : vector<4x1xf32>
    %c0_104 = arith.constant 0 : index
    %c0_105 = arith.constant 0 : index
    %110 = vector.load %arg13[%c0_104, %c0_105] : memref<4x4xf32, #tpu.memory_space<vmem>>, vector<4x4xf32>
    %cst_106 = arith.constant dense<0.000000e+00> : vector<4x1xf32>
    %111 = tpu.matmul %110, %109, %cst_106 {dimension_numbers = #tpu.dot_dimension_numbers<[1], [0], [0], [1], [0, 0, 1, 1], [], []>} : vector<4x4xf32>, vector<4x1xf32>, vector<4x1xf32> -> vector<4x1xf32>
    %c0_107 = arith.constant 0 : index
    %c0_108 = arith.constant 0 : index
    %112 = vector.load %arg14[%c0_107, %c0_108] : memref<4x1xf32, #tpu.memory_space<vmem>>, vector<4x1xf32>
    %113 = arith.addf %111, %112 : vector<4x1xf32>
    %114 = arith.negf %113 : vector<4x1xf32>
    %115 = math.exp %114 : vector<4x1xf32>
    %cst_109 = arith.constant 1.000000e+00 : f32
    %116 = vector.broadcast %cst_109 : f32 to vector<4x1xf32>
    %117 = arith.addf %116, %115 : vector<4x1xf32>
    %118 = arith.divf %116, %117 : vector<4x1xf32>
    %c0_110 = arith.constant 0 : index
    %c0_111 = arith.constant 0 : index
    %119 = vector.load %arg15[%c0_110, %c0_111] : memref<1x4xf32, #tpu.memory_space<vmem>>, vector<1x4xf32>
    %cst_112 = arith.constant dense<0.000000e+00> : vector<1x256xf32>
    %120 = tpu.matmul %119, %101, %cst_112 {dimension_numbers = #tpu.dot_dimension_numbers<[1], [0], [0], [1], [0, 0, 1, 1], [], []>} : vector<1x4xf32>, vector<4x256xf32>, vector<1x256xf32> -> vector<1x256xf32>
    %c0_113 = arith.constant 0 : index
    %c0_114 = arith.constant 0 : index
    %121 = vector.load %arg16[%c0_113, %c0_114] : memref<1x1xf32, #tpu.memory_space<vmem>>, vector<1x1xf32>
    %122 = vector.broadcast %121 : vector<1x1xf32> to vector<1x256xf32>
    %123 = arith.addf %120, %122 : vector<1x256xf32>
    %124 = arith.negf %123 : vector<1x256xf32>
    %125 = math.exp %124 : vector<1x256xf32>
    %cst_115 = arith.constant 1.000000e+00 : f32
    %126 = vector.broadcast %cst_115 : f32 to vector<1x256xf32>
    %127 = arith.addf %126, %125 : vector<1x256xf32>
    %128 = arith.divf %126, %127 : vector<1x256xf32>
    %129 = vector.broadcast %118 : vector<4x1xf32> to vector<4x256xf32>
    %130 = arith.mulf %101, %129 : vector<4x256xf32>
    %131 = vector.broadcast %128 : vector<1x256xf32> to vector<4x256xf32>
    %132 = arith.mulf %101, %131 : vector<4x256xf32>
    %133 = arith.maximumf %130, %132 : vector<4x256xf32>
    %cst_116 = arith.constant 0.000000e+00 : f32
    %134 = vector.broadcast %cst_116 : f32 to vector<4x256xf32>
    %135 = arith.maximumf %133, %134 : vector<4x256xf32>
    %c0_117 = arith.constant 0 : index
    %c0_118 = arith.constant 0 : index
    %c0_119 = arith.constant 0 : index
    %136 = vector.load %arg17[%c0_117, %c0_118, %c0_119] : memref<1x4x256xf32, #tpu.memory_space<vmem>>, vector<1x4x256xf32>
    %137 = vector.shape_cast %136 : vector<1x4x256xf32> to vector<4x256xf32>
    %138 = vector.shape_cast %135 : vector<4x256xf32> to vector<1x4x256xf32>
    tpu.vector_store %arg17[%c0_117, %c0_118, %c0_119], %138 {strides = array<i32>} : memref<1x4x256xf32, #tpu.memory_space<vmem>>, vector<1x4x256xf32>,
    return
  }
  func.func @transform_0(%arg0: i32) -> (i32, i32, i32) {
    %c0_i32 = arith.constant 0 : i32
    %c0_i32_0 = arith.constant 0 : i32
    %c0_i32_1 = arith.constant 0 : i32
    return %arg0, %c0_i32, %c0_i32_0 : i32, i32, i32
  }
  func.func @transform_1(%arg0: i32) -> (i32, i32) {
    %c0_i32 = arith.constant 0 : i32
    %c0_i32_0 = arith.constant 0 : i32
    %c0_i32_1 = arith.constant 0 : i32
    return %c0_i32, %c0_i32_0 : i32, i32
  }
  func.func @transform_2(%arg0: i32) -> (i32, i32) {
    %c0_i32 = arith.constant 0 : i32
    %c0_i32_0 = arith.constant 0 : i32
    %c0_i32_1 = arith.constant 0 : i32
    return %c0_i32, %c0_i32_0 : i32, i32
  }
  func.func @transform_3(%arg0: i32) -> (i32, i32) {
    %c0_i32 = arith.constant 0 : i32
    %c0_i32_0 = arith.constant 0 : i32
    %c0_i32_1 = arith.constant 0 : i32
    return %c0_i32, %c0_i32_0 : i32, i32
  }
  func.func @transform_4(%arg0: i32) -> (i32, i32) {
    %c0_i32 = arith.constant 0 : i32
    %c0_i32_0 = arith.constant 0 : i32
    %c0_i32_1 = arith.constant 0 : i32
    return %c0_i32, %c0_i32_0 : i32, i32
  }
  func.func @transform_5(%arg0: i32) -> (i32, i32) {
    %c0_i32 = arith.constant 0 : i32
    %c0_i32_0 = arith.constant 0 : i32
    %c0_i32_1 = arith.constant 0 : i32
    return %c0_i32, %c0_i32_0 : i32, i32
  }
  func.func @transform_6(%arg0: i32) -> (i32, i32) {
    %c0_i32 = arith.constant 0 : i32
    %c0_i32_0 = arith.constant 0 : i32
    %c0_i32_1 = arith.constant 0 : i32
    return %c0_i32, %c0_i32_0 : i32, i32
  }
  func.func @transform_7(%arg0: i32) -> (i32, i32) {
    %c0_i32 = arith.constant 0 : i32
    %c0_i32_0 = arith.constant 0 : i32
    %c0_i32_1 = arith.constant 0 : i32
    return %c0_i32, %c0_i32_0 : i32, i32
  }
  func.func @transform_8(%arg0: i32) -> (i32, i32) {
    %c0_i32 = arith.constant 0 : i32
    %c0_i32_0 = arith.constant 0 : i32
    %c0_i32_1 = arith.constant 0 : i32
    return %c0_i32, %c0_i32_0 : i32, i32
  }
  func.func @transform_9(%arg0: i32) -> (i32, i32) {
    %c0_i32 = arith.constant 0 : i32
    %c0_i32_0 = arith.constant 0 : i32
    %c0_i32_1 = arith.constant 0 : i32
    return %c0_i32, %c0_i32_0 : i32, i32
  }
  func.func @transform_10(%arg0: i32) -> (i32, i32) {
    %c0_i32 = arith.constant 0 : i32
    %c0_i32_0 = arith.constant 0 : i32
    %c0_i32_1 = arith.constant 0 : i32
    return %c0_i32, %c0_i32_0 : i32, i32
  }
  func.func @transform_11(%arg0: i32) -> (i32, i32) {
    %c0_i32 = arith.constant 0 : i32
    %c0_i32_0 = arith.constant 0 : i32
    %c0_i32_1 = arith.constant 0 : i32
    return %c0_i32, %c0_i32_0 : i32, i32
  }
  func.func @transform_12(%arg0: i32) -> (i32, i32) {
    %c0_i32 = arith.constant 0 : i32
    %c0_i32_0 = arith.constant 0 : i32
    %c0_i32_1 = arith.constant 0 : i32
    return %c0_i32, %c0_i32_0 : i32, i32
  }
  func.func @transform_13(%arg0: i32) -> (i32, i32) {
    %c0_i32 = arith.constant 0 : i32
    %c0_i32_0 = arith.constant 0 : i32
    %c0_i32_1 = arith.constant 0 : i32
    return %c0_i32, %c0_i32_0 : i32, i32
  }
  func.func @transform_14(%arg0: i32) -> (i32, i32) {
    %c0_i32 = arith.constant 0 : i32
    %c0_i32_0 = arith.constant 0 : i32
    %c0_i32_1 = arith.constant 0 : i32
    return %c0_i32, %c0_i32_0 : i32, i32
  }
  func.func @transform_15(%arg0: i32) -> (i32, i32) {
    %c0_i32 = arith.constant 0 : i32
    %c0_i32_0 = arith.constant 0 : i32
    %c0_i32_1 = arith.constant 0 : i32
    return %c0_i32, %c0_i32_0 : i32, i32
  }
  func.func @transform_16(%arg0: i32) -> (i32, i32, i32) {
    %c0_i32 = arith.constant 0 : i32
    %c0_i32_0 = arith.constant 0 : i32
    %c0_i32_1 = arith.constant 0 : i32
    return %arg0, %c0_i32, %c0_i32_0 : i32, i32, i32
  }
}

</mosaic_0001>

<bundles_post_ra>
// kernel: tpu_custom_call.1
= control target key start
LH: loop header
LB: loop body
LE: loop exit
PB: predicated region body
PF: predicated region fallthrough
CT: control target
= control target key end

     0   :  { %s2377_s0 = inlined_call_operand.vmem [shape: f32[2,4,401], index: 0, kind: input, shape index: {}]   ;;  %s2378_s1 = inlined_call_operand.vmem [shape: f32[2,256], index: 1, kind: input, shape index: {}]   ;;  %s2379_s2 = inlined_call_operand.vmem [shape: f32[4,36], index: 2, kind: input, shape index: {}]   ;;  %s2380_s3 = inlined_call_operand.vmem [shape: f32[4,36], index: 3, kind: input, shape index: {}]   ;;  %s2381_s4 = inlined_call_operand.vmem [shape: f32[4,36], index: 4, kind: input, shape index: {}]   ;;  %s2382_s5 = inlined_call_operand.vmem [shape: f32[4,1], index: 5, kind: input, shape index: {}]   ;;  %s2383_s6 = inlined_call_operand.vmem [shape: f32[4,1], index: 6, kind: input, shape index: {}]   ;;  %s2384_s7 = inlined_call_operand.vmem [shape: f32[4,1], index: 7, kind: input, shape index: {}]   ;;  %s2385_s8 = inlined_call_operand.vmem [shape: f32[4,1], index: 8, kind: input, shape index: {}]   ;;  %s2386_s9 = inlined_call_operand.vmem [shape: f32[4,1], index: 9, kind: input, shape index: {}]   ;;  %s2387_s10 = inlined_call_operand.vmem [shape: f32[4,4], index: 10, kind: input, shape index: {}]   ;;  %s2388_s11 = inlined_call_operand.vmem [shape: f32[4,1], index: 11, kind: input, shape index: {}]   ;;  %s2389_s12 = inlined_call_operand.vmem [shape: f32[4,4], index: 12, kind: input, shape index: {}]   ;;  %s2390_s13 = inlined_call_operand.vmem [shape: f32[4,1], index: 13, kind: input, shape index: {}]   ;;  %s2391_s14 = inlined_call_operand.vmem [shape: f32[1,4], index: 14, kind: input, shape index: {}]   ;;  %s2392_s15 = inlined_call_operand.<no memory space> [shape: f32[1,1], index: 15, kind: input, shape index: {}]   ;;  %s2393_s16 = inlined_call_operand.hbm [shape: f32[2,4,256], index: 16, kind: output, shape index: {}]  }
   0x1   :  { %2404 = sst [smem:[#allocation8_spill]] %s2377_s0  ;;  %v21_v0 = vstv %s2392_s15 }
   0x2   :  { %2405 = sst [smem:[#allocation9_spill]] %s2378_s1  ;;  %22 = vst [vmem:[#allocation4] sm:$0x1] %v21_v0 }
   0x3   :  { %2406 = sst [smem:[#allocation10_spill]] %s2379_s2 }
   0x4   :  { %2407 = sst [smem:[#allocation11_spill]] %s2380_s3 }
   0x5   :  { %2408 = sst [smem:[#allocation12_spill]] %s2381_s4 }
   0x6   :  { %23 = vsyncpa [#allocation6], 0 }
   0x7   :  { %25 = vsyncpa [#allocation6 + $0x1], 0  ;;  %s2013_s23 = smov 0   ;;  %s2015_s24 = smov 0  }
   0x8   :  { %s2017_s25 = smov 0   ;;  %s2019_s26 = smov 0  }
   0x9 LB: > { %s2034_s15 = sadd.s32 4294967295, %s1910_s26   ;;  %s1651_s27 = sadd.s32 4294967294, %s1910_s26   ;;  %s1910_s26 = sphi %s2019_s26, %s2424_s26   ;;  %s1906_s25 = sphi %s2017_s25, %s2423_s25   ;;  %s1902_s24 = sphi %s2015_s24, %s2422_s24   ;;  %s1898_s23 = sphi %s2013_s23, %s2421_s23  }
   0xa   : > { %s2038_s28 = sadd.s32 1, %s1910_s26   ;;  %s379_s29 = sadd.s32 1, %s1906_s25 }
   0xb   : > { %s376_s30 = ssub.s32 %s1910_s26, %s2038_s28  ;;  %p389_p0 = scmp.ne.s32.totalorder %s1906_s25, %s1902_s24 }
   0xc   : > { %p377_p1 = scmp.eq.s32.totalorder %s376_s30, 0  ;;  %p390_p2 = scmp.eq.s32.totalorder %s2034_s15, 1 }
   0xd   : > { %p395_p3 = scmp.ne.s32.totalorder %s1902_s24, %s1898_s23  ;;  %p396_p4 = scmp.eq.s32.totalorder %s1651_s27, 1 }
   0xe   : > { %s2049_s0 = scalar_select %p377_p1, %s1906_s25, %s379_s29  }
   0xf   : > { %p2051_p5 = por %p390_p2, %p389_p0  ;;  %p2055_p6 = por %p396_p4, %p395_p3 }
  0x10   : > { %p1654_p7 = scmp.ge.s32.totalorder %s1910_s26, 1  ;;  %p467_p8 = scmp.lt.s32.totalorder %s1910_s26, 3 }
  0x12   : > { %p468_p9 = pnand %p1654_p7, %p467_p8 }
  0x13   : > { %v528_v1 = vlaneseq (!%p468_p9)  ;;  %s2411_s1 = sld [smem:[#allocation9_spill]] (!%p468_p9)  ;;  %vm940_vm0 = vcmask (!%p468_p9), 134144   ;;  %p517_p10 = scmp.lt.s32.totalorder (!%p468_p9), %s2034_s15, 1  ;;  %v1912_v5 = vmov (!%p468_p9), 0.0   ;;  %v1921_v19 = vmov (!%p468_p9), 0  }
  0x14   : > { %471 = sbr.rel (%p468_p9) target bundleno = 1756 (0x6dc), region = 84  ;;  %941 = vst.msk [vmem:[#allocation3 + $0xc] sm:$0xf] (!%p468_p9), %vm940_vm0, %v1912_v5  ;;  %939 = vst [vmem:[#allocation3] sm:$0xf] (!%p468_p9), %v1912_v5  ;;  %833 = vmatprep.mubr.f32.mxu0 (!%p468_p9), %v1912_v5  ;;  %932 = vmatprep.mubr.f32.mxu1 (!%p468_p9), %v1912_v5  ;;  %s2412_s20 = sld [smem:[#allocation8_spill]] (!%p468_p9) }
  0x15   : > { %v529_v3 = vshrl.u32 (!%p468_p9), %v528_v1, 7  ;;  %s1913_s22 = smov (!%p468_p9), 127   ;;  %s2400_s30 = smov (!%p468_p9), 1   ;;  %1825 = vset.pattern.permute.xlu0 (!%p468_p9), %v1921_v19  ;;  %1826 = vset.pattern.permute.xlu1 (!%p468_p9), %v1921_v19  ;;  %vm623_vm1 = vcmask (!%p468_p9), 1039360   ;;  %vm540_vm2 = vcmask (!%p468_p9), 908288   ;;  %vm596_vm3 = vcmask (!%p468_p9), 924672  }
  0x16   : > { %s2396_s19 = smov (!%p468_p9), 17   ;;  %vm639_vm4 = vcmask (!%p468_p9), 7168   ;;  %vm574_vm5 = vcmask (!%p468_p9), 130048   ;;  %vm611_vm6 = vcmask (!%p468_p9), 121856   ;;  %vm715_vm7 = vcmask (!%p468_p9), 916480   ;;  %s2414_s2 = sld [smem:[#allocation10_spill]] (!%p468_p9) }
  0x17   : > { %v2072_v6 = vsub.s32 (!%p468_p9), 0, %v529_v3  ;;  %v534_v7 = vsub.s32 (!%p468_p9), 1, %v529_v3  ;;  %vm555_vm8 = vcmask (!%p468_p9), 138240   ;;  %vm762_vm9 = vcmask (!%p468_p9), 1043456   ;;  %s2415_s3 = sld [smem:[#allocation11_spill]] (!%p468_p9)  ;;  %s2420_s4 = sld [smem:[#allocation12_spill]] (!%p468_p9) }
  0x18   : > { %vm758_vm10 = vcmask (!%p468_p9), 293888   ;;  %vm1923_vm11 = vmmov (!%p468_p9), 0   ;;  %vm1286_vm12 = vcmask (!%p468_p9), 31744  }
  0x19   : > { %v522_v2 = vld [vmem:[%s2411_s1] ss:$2 sm:$0x3] (!%p468_p9)  ;;  %v1658_v4 = vld [vmem:[%s2411_s1 + $0x1] ss:$2 sm:$0x3] (!%p468_p9) }
  0x1a   : > { %v531_v8 = vrot.slane (!%p468_p9), %v522_v2, %v2072_v6  ;;  %v535_v9 = vrot.slane (!%p468_p9), %v522_v2, %v534_v7  ;;  %v587_v10 = vrot.slane (!%p468_p9), %v1658_v4, %v2072_v6  ;;  %v591_v11 = vrot.slane (!%p468_p9), %v1658_v4, %v534_v7  ;;  %s2394_s1 = smov (!%p468_p9), 111  }
  0x1b   : > { %s518_s27 = scalar_select %p517_p10, %s2034_s15, 1 }
  0x1c   : > { %v536_v12 = vcombine.low %v531_v8, %v535_v9  ;;  %v592_v13 = vcombine.low %v587_v10, %v591_v11 }
  0x1d   : > { %s1683_s29 = sshll.u32 %s518_s27, 4  ;;  %s1915_s27 = smov 113  }
  0x1e   : > { %s2080_s21 = scalar_lea.vmem %s2412_s20, %s1683_s29  ;;  %620 = vrot.lane.b32.xlu1 %v536_v12, %s1913_s22  ;;  %537 = vrot.lane.b32.xlu0 %v536_v12, %s2394_s1  ;;  %s2398_s29 = smov 15  }
  0x1f   : > { %v2085_v14 = vld [vmem:[%s2080_s21 + $0x4] sm:$0xff]  ;;  %s2402_s20 = smov 16   ;;  %v1829_v18 = vld [vmem:[%s2080_s21 + $0xc] ss:$0 sps:$4 sm:$0xff]   ;;  %s1920_s1 = smov 112  }
  0x20   : > { %650 = vst [vmem:[#allocation2 + $0x20] sm:$0xf] %v2085_v14  ;;  %v1827_v15 = vld [vmem:[%s2080_s21 + $0x8] ss:$0 sps:$4 sm:$0xff]   ;;  %v562_v16 = vld [vmem:[%s2080_s21] sm:$0xff]  ;;  %v648_v40 = vcombine.high %v2085_v14, %v2085_v14  ;;  %v707_v9 = vcombine.low %v2085_v14, %v2085_v14 }
  0x21   : > { %v566_v17 = vcombine.low %v562_v16, %v562_v16  ;;  %v526_v22 = vld [vmem:[%s2080_s21 + $0x8] sm:$0xf]  ;;  %v679_v34 = vld [vmem:[%s2080_s21 + $0xc] sm:$0xf] }
  0x22   : > { %593 = vrot.lane.b32.xlu0 %v592_v13, %s1915_s27  ;;  %680 = vrot.lane.b32.xlu1 %v536_v12, %s2398_s29  ;;  %v582_v30 = vld [vmem:[%s2080_s21 + $0x8] sm:$0xf]  ;;  %651 = vst [vmem:[#allocation2 + $0x28] sm:$0xf] %v648_v40  ;;  %v653_v46 = vld [vmem:[%s2080_s21 + $0xc] sm:$0xf] }
  0x23   : > { %v619_v38 = vld [vmem:[%s2080_s21 + $0x8] sm:$0xf]  ;;  %v723_v10 = vld [vmem:[%s2080_s21 + $0xc] sm:$0xf]  ;;  %v1030_v12 = vld [vmem:[#allocation3 + $0xc] sm:$0xf] }
  0x24   : > { %s2419_s21 = smov 15  }
  0x26   : > { %654 = vrot.lane.b32.xlu0 %v592_v13, %s2400_s30  ;;  %724 = vrot.lane.b32.xlu1 %v592_v13, %s2396_s19  ;;  %v841_v13 = vld [vmem:[%s2382_s5] sm:$0xf] }
  0x2a   : > { %572 = vrot.lane.b32.xlu1 %v1827_v15, %s2402_s20  ;;  %570 = vrot.lane.b32.xlu0 %v562_v16, %s2402_s20 }
  0x2e   : > { %568 = vrot.lane.b32.xlu1 %v566_v17, %s2402_s20  ;;  %711 = vrot.lane.b32.xlu0 %v2085_v14, %s1920_s1  ;;  %s2418_s20 = smov 1  }
  0x32   : > { %713 = vrot.lane.b32.xlu1 %v1829_v18, %s1920_s1  ;;  %v849_v18 = vld [vmem:[%s2383_s6] sm:$0xf] }
  0x90   : > { %v621_v20 = vpop.permute.xlu1 %620  ;;  %v538_v21 = vpop.permute.xlu0 %537 }
  0x91   : > { %v2102_v23 = vrot.slane %v621_v20, 4  ;;  %v2104_v24 = vrot.slane %v538_v21, 4 }
  0x93   : > { %v2108_v25 = vsel %vm623_vm1, %v2102_v23, %v621_v20  ;;  %v545_v26 = vmul.f32 %v2104_v24, %v526_v22  ;;  %v2115_v31 = vsel %vm540_vm2, %v2104_v24, %v538_v21  ;;  %v628_v44 = vmul.f32 %v2102_v23, %v619_v38 }
  0x94   : > { %v627_v27 = vmul.f32 %v2108_v25, %v562_v16  ;;  %v594_v28 = vpop.permute.xlu0 %593  ;;  %v681_v29 = vpop.permute.xlu1 %680  ;;  %v544_v36 = vmul.f32 %v562_v16, %v2115_v31 }
  0x95   : > { %v2117_v32 = vrot.slane %v594_v28, 4  ;;  %553 = vrot.lane.b32.xlu1 %v545_v26, %s2396_s19  ;;  %v2120_v33 = vrot.slane %v681_v29, 4  ;;  %v632_v51 = vcombine.low %v628_v44, %v628_v44 }
  0x96   : > { %635 = vrot.lane.b32.xlu0 %v627_v27, %s2400_s30  ;;  %v548_v59 = vcombine.high %v544_v36, %v544_v36  ;;  %v631_v0 = vcombine.low %v627_v27, %v627_v27 }
  0x97   : > { %v601_v35 = vmul.f32 %v2117_v32, %v582_v30  ;;  %v2131_v41 = vsel %vm596_vm3, %v2117_v32, %v594_v28  ;;  %v687_v43 = vmul.f32 %v2120_v33, %v679_v34  ;;  %v2156_v61 = vsel %vm611_vm6, %v2120_v33, %v681_v29 }
  0x98   : > { %v655_v37 = vpop.permute.xlu0 %654  ;;  %v725_v39 = vpop.permute.xlu1 %724  ;;  %v600_v45 = vmul.f32 %v2131_v41, %v562_v16  ;;  %v686_v1 = vmul.f32 %v2085_v14, %v2156_v61 }
  0x99   : > { %609 = vrot.lane.b32.xlu1 %v601_v35, %s2398_s29  ;;  %v656_v42 = vrot.slane %v655_v37, 4  ;;  %v2150_v56 = vrot.slane %v725_v39, 4 }
  0x9a   : > { %549 = vrot.lane.b32.xlu0 %v544_v36, %s2396_s19  ;;  %v604_v2 = vcombine.high %v600_v45, %v600_v45  ;;  %v690_v4 = vcombine.high %v686_v1, %v686_v1 }
  0x9b   : > { %v2140_v49 = vsel %vm639_vm4, %v656_v42, %v655_v37  ;;  %v661_v52 = vmul.f32 %v656_v42, %v653_v46  ;;  %v2164_v63 = vsel %vm555_vm8, %v2150_v56, %v725_v39  ;;  %v731_v11 = vmul.f32 %v2150_v56, %v723_v10 }
  0x9c   : > { %v573_v47 = vpop.permute.xlu1 %572  ;;  %v571_v48 = vpop.permute.xlu0 %570  ;;  %v660_v53 = vmul.f32 %v2085_v14, %v2140_v49  ;;  %v730_v3 = vmul.f32 %v2164_v63, %v2085_v14  ;;  %v1032_v15 = vmul.f32 %v1030_v12, %v656_v42  ;;  %v1050_v14 = vld [vmem:[#allocation3 + $0xc] sm:$0xf] }
  0x9d   : > { %695 = vrot.lane.b32.xlu1 %v687_v43, %s1915_s27  ;;  %v576_v50 = vsel %vm574_vm5, %v571_v48, %v573_v47  ;;  %v665_v58 = vcombine.low %v661_v52, %v661_v52  ;;  %v1052_v17 = vmul.f32 %v1050_v14, %v2120_v33 }
  0x9e   : > { %605 = vrot.lane.b32.xlu0 %v600_v45, %s2398_s29  ;;  %580 = vst [vmem:[#allocation2 + $0x8] sm:$0xf0] %v576_v50  ;;  %v734_v7 = vcombine.high %v730_v3, %v730_v3  ;;  %v664_v8 = vcombine.low %v660_v53, %v660_v53  ;;  %v1036_v16 = vcombine.low %v1032_v15, %v1032_v15 }
  0xa0   : > { %v569_v54 = vpop.permute.xlu1 %568  ;;  %v2152_v57 = vpop.permute.xlu0 %711 }
  0xa1   : > { %637 = vrot.lane.b32.xlu1 %v632_v51, %s2400_s30  ;;  %v575_v55 = vsel %vm574_vm5, %v569_v54, %v571_v48 }
  0xa2   : > { %668 = vrot.lane.b32.xlu0 %v660_v53, %s1913_s22  ;;  %579 = vst [vmem:[#allocation2] sm:$0xf0] %v575_v55 }
  0xa4   : > { %v714_v60 = vpop.permute.xlu1 %713 }
  0xa5   : > { %670 = vrot.lane.b32.xlu1 %v665_v58, %s1913_s22  ;;  %v717_v62 = vsel %vm715_vm7, %v2152_v57, %v714_v60 }
  0xa6   : > { %551 = vrot.lane.b32.xlu0 %v548_v59, %s2396_s19  ;;  %721 = vst [vmem:[#allocation2 + $0x38] sm:$0xf0] %v717_v62  ;;  %s2413_s19 = smov 111  }
  0xa9   : > { %633 = vrot.lane.b32.xlu1 %v631_v0, %s2400_s30  ;;  %s2417_s30 = smov 17  }
  0xaa   : > { %607 = vrot.lane.b32.xlu0 %v604_v2, %s2398_s29  ;;  %s2416_s29 = smov 16  }
  0xad   : > { %691 = vrot.lane.b32.xlu1 %v686_v1, %s1915_s27 }
  0xae   : > { %693 = vrot.lane.b32.xlu0 %v690_v4, %s1915_s27 }
  0xb1   : > { %737 = vrot.lane.b32.xlu1 %v734_v7, %s2413_s19 }
  0xb2   : > { %666 = vrot.lane.b32.xlu0 %v664_v8, %s1913_s22 }
  0xb5   : > { %735 = vrot.lane.b32.xlu1 %v730_v3, %s2413_s19 }
  0xb6   : > { %709 = vrot.lane.b32.xlu0 %v707_v9, %s1920_s1 }
  0xb9   : > { %852 = vperm.xlu1 %1826, %v849_v18  }
  0xba   : > { %739 = vrot.lane.b32.xlu0 %v731_v11, %s2413_s19 }
  0xbe   : > { %844 = vperm.xlu0 %1825, %v841_v13   ;;  %v840_v13 = vld [vmem:[%s2415_s3] sm:$0xf] }
  0xc2   : > { %1041 = vrot.lane.b32.xlu0 %v1036_v16, %s1913_s22  ;;  %v1831_v16 = vld [vmem:[#allocation3 + $0xc] ss:$0 sps:$4 sm:$0xff]  }
  0xc6   : > { %1060 = vrot.lane.b32.xlu0 %v1052_v17, %s1915_s27 }
  0xca   : > { %1078 = vrot.lane.b32.xlu0 %v1831_v16, %s1920_s1 }
 0x107   : > { %v554_v19 = vpop.permute.xlu1 %553 }
 0x108   : > { %v636_v20 = vpop.permute.xlu0 %635 }
 0x10b   : > { %v610_v21 = vpop.permute.xlu1 %609 }
 0x10c   : > { %v550_v22 = vpop.permute.xlu0 %549 }
 0x10f   : > { %v696_v26 = vpop.permute.xlu1 %695 }
 0x110   : > { %v606_v27 = vpop.permute.xlu0 %605 }
 0x113   : > { %v638_v28 = vpop.permute.xlu1 %637 }
 0x114   : > { %v641_v29 = vsel %vm639_vm4, %v636_v20, %v638_v28  ;;  %v669_v30 = vpop.permute.xlu0 %668 }
 0x115   : > { %645 = vst [vmem:[#allocation2 + $0x18] sm:$0xf0] %v641_v29 }
 0x117   : > { %v671_v34 = vpop.permute.xlu1 %670 }
 0x118   : > { %v673_v33 = vsel %vm623_vm1, %v669_v30, %v671_v34  ;;  %v552_v35 = vpop.permute.xlu0 %551 }
 0x119   : > { %677 = vst [vmem:[#allocation2 + $0x28] sm:$0xf0] %v673_v33  ;;  %v556_v36 = vsel %vm555_vm8, %v550_v22, %v552_v35  ;;  %v557_v37 = vsel %vm555_vm8, %v552_v35, %v554_v19 }
 0x11a   : > { %560 = vst [vmem:[#allocation2] sm:$0xf] %v556_v36  ;;  %561 = vst [vmem:[#allocation2 + $0x8] sm:$0xf] %v557_v37 }
 0x11b   : > { %v634_v38 = vpop.permute.xlu1 %633 }
 0x11c   : > { %v640_v39 = vsel %vm639_vm4, %v634_v38, %v636_v20  ;;  %v608_v40 = vpop.permute.xlu0 %607 }
 0x11d   : > { %644 = vst [vmem:[#allocation2 + $0x10] sm:$0xf0] %v640_v39  ;;  %v612_v42 = vsel %vm611_vm6, %v606_v27, %v608_v40  ;;  %v613_v43 = vsel %vm611_vm6, %v608_v40, %v610_v21 }
 0x11e   : > { %616 = vst [vmem:[#allocation2 + $0x10] sm:$0xf] %v612_v42  ;;  %617 = vst [vmem:[#allocation2 + $0x18] sm:$0xf] %v613_v43 }
 0x11f   : > { %v692_v44 = vpop.permute.xlu1 %691 }
 0x120   : > { %v694_v45 = vpop.permute.xlu0 %693  ;;  %v752_v2 = vld [vmem:[#allocation2 + $0x28] sm:$0xff] }
 0x121   : > { %v697_v46 = vsel %vm596_vm3, %v692_v44, %v694_v45  ;;  %v698_v47 = vsel %vm596_vm3, %v694_v45, %v696_v26  ;;  %v748_v51 = vld [vmem:[#allocation2 + $0x8] sm:$0xff]  ;;  %v747_v54 = vld [vmem:[#allocation2] sm:$0xff] }
 0x122   : > { %701 = vst [vmem:[#allocation2 + $0x30] sm:$0xf] %v697_v46  ;;  %702 = vst [vmem:[#allocation2 + $0x38] sm:$0xf] %v698_v47 }
 0x123   : > { %v738_v48 = vpop.permute.xlu1 %737 }
 0x124   : > { %v667_v50 = vpop.permute.xlu0 %666 }
 0x125   : > { %v672_v52 = vsel %vm623_vm1, %v667_v50, %v669_v30  ;;  %v750_v53 = vld [vmem:[#allocation2 + $0x18] sm:$0xff]  ;;  %v749_v55 = vld [vmem:[#allocation2 + $0x10] sm:$0xff] }
 0x126   : > { %676 = vst [vmem:[#allocation2 + $0x20] sm:$0xf0] %v672_v52  ;;  %v1734_v58 = vpack.c.bf16 %v750_v53, %v748_v51  ;;  %v1736_v59 = vpack.c.bf16 %v749_v55, %v747_v54  ;;  %v1449_v52 = vld [vmem:[#allocation4] sm:$0x1]  ;;  %v1087_v53 = vld [vmem:[#allocation3 + $0xc] sm:$0xf] }
 0x127   : > { %v736_v60 = vpop.permute.xlu1 %735  ;;  %v1089_v54 = vmul.f32 %v1087_v53, %v2150_v56  ;;  %v1196_v55 = vld [vmem:[%s2384_s7] sm:$0xf] }
 0x128   : > { %v741_v62 = vsel %vm540_vm2, %v736_v60, %v738_v48  ;;  %1735 = vmatprep.subr.bf16.mxu0 %v1734_v58  ;;  %1743 = vmatprep.subr.bf16.mxu1 %v1734_v58  ;;  %v710_v0 = vpop.permute.xlu0 %709  ;;  %v1204_v58 = vld [vmem:[%s2385_s8] sm:$0xf] }
 0x129   : > { %745 = vst [vmem:[#allocation2 + $0x40] sm:$0xf] %v741_v62  ;;  %v716_v1 = vsel %vm715_vm7, %v710_v0, %v2152_v57  ;;  %1737 = vmatpush1.bf16.msra.mxu0 %v1736_v59  ;;  %1745 = vmatpush1.bf16.msra.mxu1 %v1736_v59  ;;  %v754_v3 = vld [vmem:[#allocation2 + $0x38] sm:$0xff]  ;;  %v757_v57 = vld [vmem:[%s2414_s2] sm:$0xf] }
 0x12a   : > { %720 = vst [vmem:[#allocation2 + $0x30] sm:$0xf0] %v716_v1  ;;  %v1738_v4 = vpack.c.bf16 %v754_v3, %v752_v2  ;;  %v1922_v59 = vmov 0.00390625|0.00390625  }
 0x12c   : > { %1739 = vmatprep.subr.bf16.mxu0 %v1738_v4  ;;  %1747 = vmatprep.subr.bf16.mxu1 %v1738_v4  ;;  %v740_v7 = vpop.permute.xlu0 %739 }
 0x12d   : > { %v742_v8 = vsel %vm540_vm2, %v738_v48, %v740_v7  ;;  %v751_v9 = vld [vmem:[#allocation2 + $0x20] sm:$0xff] }
 0x12e   : > { %746 = vst [vmem:[#allocation2 + $0x48] sm:$0xf] %v742_v8 }
 0x130   : > { %v755_v15 = vld [vmem:[#allocation2 + $0x40] sm:$0xf] }
 0x131   : > { %v753_v10 = vld [vmem:[#allocation2 + $0x30] sm:$0xff] }
 0x132   : > { %v1740_v11 = vpack.c.bf16 %v753_v10, %v751_v9 }
 0x134   : > { %1741 = vmatpush1.bf16.msra.mxu0 %v1740_v11  ;;  %1749 = vmatpush1.bf16.msra.mxu1 %v1740_v11 }
 0x135   : > { %v756_v12 = vld [vmem:[#allocation2 + $0x48] sm:$0xf] }
 0x136   : > { %1659 = vmatprep.subr.msk.mxu0 %vm762_vm9, %v756_v12  ;;  %1662 = vmatprep.subr.msk.mxu1 %vm762_vm9, %v756_v12 }
 0x138   : > { %1660 = vmatpush1.msk.msra.mxu0 %vm762_vm9, %v755_v15  ;;  %1663 = vmatpush1.msk.msra.mxu1 %vm762_vm9, %v755_v15  ;;  %v853_v18 = vpop.permute.xlu1 %852 }
 0x139   : > { %1661 = vmatmul.mubr.msk.f32.vlgmr.msra.gmra.mrb[0].mxu0 %vm758_vm10, %v757_v57  ;;  %1664 = vmatmul.mubr.msk.f32.vlgmr.msra.gmra.mrb[0].mxu1 %vm758_vm10, %v840_v13 }
 0x13a   : > { %1189 = vmatprep.mubr.f32.mxu0 %v1912_v5  ;;  %1758 = vmatprep.subr.bf16.mxu1 %v1922_v59 }
 0x13b   : > { %1759 = vmatpush3.bf16.msra.mxu1 %v1922_v59 }
 0x13c   : > { %1760 = vmatprep.subr.bf16.mxu1 %v1922_v59 }
 0x13d   : > { %v845_v14 = vpop.permute.xlu0 %844 }
 0x13f   : > { %1761 = vmatpush3.bf16.msra.mxu1 %v1922_v59 }
 0x140   : > { %1762 = vmatprep.subr.bf16.mxu1 %v1922_v59 }
 0x141   : > { %v1042_v56 = vpop.permute.xlu0 %1041 }
 0x143   : > { %1763 = vmatpush3.bf16.msra.mxu1 %v1922_v59 }
 0x144   : > { %1764 = vmatprep.subr.bf16.mxu1 %v1922_v59 }
 0x145   : > { %v1061_v60 = vpop.permute.xlu0 %1060 }
 0x147   : > { %1765 = vmatpush3.bf16.msra.mxu1 %v1922_v59 }
 0x148   : > { %1766 = vmatprep.subr.bf16.mxu1 %v1922_v59 }
 0x149   : > { %v1079_v62 = vpop.permute.xlu0 %1078 }
 0x14b   : > { %1767 = vmatpush3.bf16.msra.mxu1 %v1922_v59 }
 0x14c   : > { %1768 = vmatprep.subr.bf16.mxu1 %v1922_v59 }
 0x14f   : > { %1769 = vmatpush3.bf16.msra.mxu1 %v1922_v59 }
 0x150   : > { %1770 = vmatprep.subr.bf16.mxu1 %v1922_v59 }
 0x153   : > { %1771 = vmatpush3.bf16.msra.mxu1 %v1922_v59 }
 0x154   : > { %1772 = vmatprep.subr.bf16.mxu1 %v1922_v59 }
 0x157   : > { %1773 = vmatpush3.bf16.msra.mxu1 %v1922_v59 }
 0x20c   : > { %v835_v17 = vpop.f32.mrb[0].mxu0  ;;  %v2246_v48 = vpop.f32.mrb[0].mxu1 }
 0x20d   : > { %v847_v19 = vmul.f32 %v845_v14, %v835_v17  ;;  %v837_v20 = vpop.f32.mrb[1].mxu0  ;;  %v2248_v50 = vpop.f32.mrb[1].mxu1 }
 0x20e   : > { %v848_v21 = vmul.f32 %v845_v14, %v837_v20 }
 0x20f   : > { %v855_v22 = vadd.f32 %v853_v18, %v847_v19 }
 0x210   : > { %v856_v26 = vadd.f32 %v853_v18, %v848_v21 }
 0x211   : > { %v857_v27 = vmax.f32 %v855_v22, 0.0 }
 0x212   : > { %v858_v28 = vmax.f32 %v856_v26, 0.0 }
 0x213   : > { %v1847_v51 = vcombine.low %v857_v27, %v857_v27 }
 0x214   : > { %v944_v29 = vcombine.low %v857_v27, %v858_v28  ;;  %v1846_v30 = vcombine.low %v858_v28, %v858_v28 }
 0x216   : > { %946 = vst [vmem:[#allocation3 + $0x4] sm:$0xff] %v944_v29  ;;  %1027 = vst [vmem:[#allocation2 + $0x20] sm:$0xf] %v944_v29  ;;  %v1088_v46 = vmul.f32 %v944_v29, %v2164_v63  ;;  %v859_v63 = vld [vmem:[%s2386_s9] sm:$0xf] }
 0x217   : > { %1028 = vst [vmem:[#allocation2 + $0x28] sm:$0xf] %v1846_v30 }
 0x218   : > { %v1092_v47 = vcombine.high %v1088_v46, %v1088_v46 }
 0x21d   : > { %v966_v34 = vld [vmem:[#allocation3] sm:$0xff]  ;;  %v948_v33 = vld [vmem:[#allocation3 + $0x8] sm:$0xf] }
 0x21e   : > { %974 = vrot.lane.b32.xlu1 %v966_v34, %s2416_s29  ;;  %v950_v35 = vmul.f32 %v948_v33, %v2104_v24  ;;  %v1833_v36 = vld [vmem:[#allocation3 + $0x8] ss:$0 sps:$4 sm:$0xff]   ;;  %v1005_v38 = vmul.f32 %v966_v34, %v2108_v25  ;;  %v949_v42 = vmul.f32 %v966_v34, %v2115_v31  ;;  %v970_v24 = vcombine.low %v966_v34, %v966_v34 }
 0x21f   : > { %v985_v37 = vld [vmem:[#allocation3 + $0x8] sm:$0xf]  ;;  %v986_v44 = vmul.f32 %v966_v34, %v2131_v41 }
 0x220   : > { %958 = vrot.lane.b32.xlu0 %v950_v35, %s2417_s30  ;;  %v987_v39 = vmul.f32 %v985_v37, %v2117_v32  ;;  %v1004_v40 = vld [vmem:[#allocation3 + $0x8] sm:$0xf]  ;;  %v1031_v32 = vmul.f32 %v944_v29, %v2140_v49  ;;  %v1009_v45 = vcombine.low %v1005_v38, %v1005_v38  ;;  %v953_v31 = vcombine.high %v949_v42, %v949_v42 }
 0x221   : > { %v1006_v43 = vmul.f32 %v1004_v40, %v2102_v23  ;;  %v1051_v23 = vmul.f32 %v944_v29, %v2156_v61  ;;  %v990_v41 = vcombine.high %v986_v44, %v986_v44 }
 0x222   : > { %1076 = vrot.lane.b32.xlu1 %v944_v29, %s1920_s1  ;;  %v1035_v61 = vcombine.low %v1031_v32, %v1031_v32 }
 0x223   : > { %v1010_v25 = vcombine.low %v1006_v43, %v1006_v43  ;;  %v1055_v49 = vcombine.high %v1051_v23, %v1051_v23 }
 0x224   : > { %976 = vrot.lane.b32.xlu0 %v1833_v36, %s2416_s29 }
 0x226   : > { %1013 = vrot.lane.b32.xlu1 %v1005_v38, %s2418_s20 }
 0x228   : > { %995 = vrot.lane.b32.xlu0 %v987_v39, %s2419_s21 }
 0x22a   : > { %954 = vrot.lane.b32.xlu1 %v949_v42, %s2417_s30 }
 0x22c   : > { %972 = vrot.lane.b32.xlu0 %v970_v24, %s2416_s29 }
 0x22e   : > { %991 = vrot.lane.b32.xlu1 %v986_v44, %s2419_s21 }
 0x230   : > { %1015 = vrot.lane.b32.xlu0 %v1010_v25, %s2418_s20 }
 0x232   : > { %1039 = vrot.lane.b32.xlu1 %v1031_v32, %s1913_s22 }
 0x234   : > { %1011 = vrot.lane.b32.xlu0 %v1009_v45, %s2418_s20 }
 0x236   : > { %956 = vrot.lane.b32.xlu1 %v953_v31, %s2417_s30 }
 0x238   : > { %1056 = vrot.lane.b32.xlu0 %v1051_v23, %s1915_s27 }
 0x23a   : > { %993 = vrot.lane.b32.xlu1 %v990_v41, %s2419_s21  ;;  %s1684_s21 = sshll.u32 %s2034_s15, 7  ;;  %s1924_s15 = smov [#allocation5]  }
 0x23b   : > { %s2335_s30 = scalar_lea.hbm %s2393_s16, %s1684_s21 }
 0x23c   : > { %1095 = vrot.lane.b32.xlu0 %v1092_v47, %s2413_s19 }
 0x23e   : > { %1058 = vrot.lane.b32.xlu1 %v1055_v49, %s1915_s27  ;;  %s514_s27 = sand.u32 1, %s1902_s24  }
 0x23f   : > { %s1655_s20 = sshll.u32 %s514_s27, 3  ;;  %s1578_s2 = scalar_lea.sflag [#allocation6], %s514_s27 }
 0x240   : > { %1093 = vrot.lane.b32.xlu0 %v1088_v46, %s2413_s19  ;;  %s516_s29 = scalar_lea.vmem [#allocation5], %s1655_s20  ;;  %s1852_s20 = sshll.u32 %s1924_s15, 4  ;;  %s1853_s20 = int_to_ptr.vmem [resolvable:$false] %s1852_s20 }
 0x242   : > { %1037 = vrot.lane.b32.xlu1 %v1035_v61, %s1913_s22 }
 0x244   : > { %862 = vperm.xlu0 %1825, %v859_v63  }
 0x246   : > { %1074 = vrot.lane.b32.xlu1 %v1847_v51, %s1920_s1  ;;  %v1105_v51 = vld [vmem:[%s2420_s4] sm:$0xf]  ;;  %s1592_s1 = sshll.u32 %s516_s29, 4  ;;  %s1854_s4 = scalar_lea.vmem %s1853_s20, 256  ;;  %s2337_s1 = int_to_ptr.vmem [resolvable:$true] %s1592_s1 }
 0x247   : > { %s1848_s3 = scalar_lea.vmem %s2337_s1, 128  ;;  %p1855_p0 = scmp.lt.s32.totalorder %s2337_s1, %s1853_s20 }
 0x248   : > { %1452 = vperm.xlu0 %1825, %v1449_v52   ;;  %p1849_p11 = scmp.ne.s32.totalorder %s2337_s1, %s1848_s3  ;;  %p1856_p1 = scmp.lt.s32.totalorder %s1854_s4, %s1848_s3 }
 0x24a   : > { %1097 = vrot.lane.b32.xlu1 %v1089_v54, %s2413_s19  ;;  %p1850_p12 = pnand %p1849_p11, %p2051_p5  ;;  %p1857_p2 = por %p1856_p1, %p1855_p0 }
 0x24c   : > { %p1851_p13 = pneg %p1850_p12 }
 0x24e   : > { %1199 = vperm.xlu1 %1826, %v1196_v55   ;;  %p1858_p3 = pnand %p1857_p2, %p1851_p13 }
 0x252   : > { %1207 = vperm.xlu1 %1826, %v1204_v58  }
 0x290   : > { %v975_v0 = vpop.permute.xlu1 %974 }
 0x292   : > { %v959_v1 = vpop.permute.xlu0 %958 }
 0x294   : > { %v1077_v2 = vpop.permute.xlu1 %1076 }
 0x295   : > { %v1081_v3 = vsel %vm715_vm7, %v1077_v2, %v1079_v62 }
 0x296   : > { %1085 = vst [vmem:[#allocation2 + $0x38] sm:$0xf0] %v1081_v3  ;;  %v977_v4 = vpop.permute.xlu0 %976 }
 0x297   : > { %v979_v7 = vsel %vm574_vm5, %v975_v0, %v977_v4 }
 0x298   : > { %983 = vst [vmem:[#allocation2 + $0x8] sm:$0xf0] %v979_v7  ;;  %v1014_v8 = vpop.permute.xlu1 %1013 }
 0x29a   : > { %v996_v9 = vpop.permute.xlu0 %995 }
 0x29c   : > { %v955_v10 = vpop.permute.xlu1 %954 }
 0x29e   : > { %v973_v11 = vpop.permute.xlu0 %972 }
 0x29f   : > { %v978_v12 = vsel %vm574_vm5, %v973_v11, %v975_v0 }
 0x2a0   : > { %982 = vst [vmem:[#allocation2] sm:$0xf0] %v978_v12  ;;  %v992_v57 = vpop.permute.xlu1 %991 }
 0x2a2   : > { %v1016_v13 = vpop.permute.xlu0 %1015 }
 0x2a3   : > { %v1018_v15 = vsel %vm639_vm4, %v1014_v8, %v1016_v13  ;;  %v1364_v13 = vld [vmem:[%s2389_s12] sm:$0xf] }
 0x2a4   : > { %1022 = vst [vmem:[#allocation2 + $0x18] sm:$0xf0] %v1018_v15  ;;  %v1040_v16 = vpop.permute.xlu1 %1039  ;;  %v1448_v15 = vld [vmem:[%s2391_s14] sm:$0x1] }
 0x2a5   : > { %v1044_v14 = vsel %vm623_vm1, %v1040_v16, %v1042_v56 }
 0x2a6   : > { %1048 = vst [vmem:[#allocation2 + $0x28] sm:$0xf0] %v1044_v14  ;;  %v1012_v17 = vpop.permute.xlu0 %1011 }
 0x2a7   : > { %v1017_v18 = vsel %vm639_vm4, %v1012_v17, %v1014_v8 }
 0x2a8   : > { %1021 = vst [vmem:[#allocation2 + $0x10] sm:$0xf0] %v1017_v18  ;;  %v957_v19 = vpop.permute.xlu1 %956 }
 0x2a9   : > { %v960_v20 = vsel %vm555_vm8, %v955_v10, %v957_v19  ;;  %v961_v21 = vsel %vm555_vm8, %v957_v19, %v959_v1 }
 0x2aa   : > { %964 = vst [vmem:[#allocation2] sm:$0xf] %v960_v20  ;;  %965 = vst [vmem:[#allocation2 + $0x8] sm:$0xf] %v961_v21  ;;  %v1057_v22 = vpop.permute.xlu0 %1056 }
 0x2ac   : > { %v994_v26 = vpop.permute.xlu1 %993 }
 0x2ad   : > { %v997_v27 = vsel %vm611_vm6, %v992_v57, %v994_v26  ;;  %v998_v28 = vsel %vm611_vm6, %v994_v26, %v996_v9  ;;  %v1111_v45 = vld [vmem:[#allocation2 + $0x28] sm:$0xff] }
 0x2ae   : > { %1001 = vst [vmem:[#allocation2 + $0x10] sm:$0xf] %v997_v27  ;;  %1002 = vst [vmem:[#allocation2 + $0x18] sm:$0xf] %v998_v28  ;;  %v1096_v29 = vpop.permute.xlu0 %1095 }
 0x2b0   : > { %v1059_v30 = vpop.permute.xlu1 %1058 }
 0x2b1   : > { %v1062_v34 = vsel %vm596_vm3, %v1057_v22, %v1059_v30  ;;  %v1063_v33 = vsel %vm596_vm3, %v1059_v30, %v1061_v60  ;;  %v1107_v38 = vld [vmem:[#allocation2 + $0x8] sm:$0xff]  ;;  %v1106_v42 = vld [vmem:[#allocation2] sm:$0xff] }
 0x2b2   : > { %1066 = vst [vmem:[#allocation2 + $0x30] sm:$0xf] %v1062_v34  ;;  %1067 = vst [vmem:[#allocation2 + $0x38] sm:$0xf] %v1063_v33  ;;  %v1094_v35 = vpop.permute.xlu0 %1093 }
 0x2b3   : > { %v1099_v36 = vsel %vm540_vm2, %v1094_v35, %v1096_v29 }
 0x2b4   : > { %1103 = vst [vmem:[#allocation2 + $0x40] sm:$0xf] %v1099_v36  ;;  %v1038_v37 = vpop.permute.xlu1 %1037 }
 0x2b5   : > { %v1043_v39 = vsel %vm623_vm1, %v1038_v37, %v1040_v16  ;;  %v1109_v40 = vld [vmem:[#allocation2 + $0x18] sm:$0xff]  ;;  %v1108_v24 = vld [vmem:[#allocation2 + $0x10] sm:$0xff]  ;;  %v1365_v16 = vld [vmem:[%s2390_s13] sm:$0xf] }
 0x2b6   : > { %1047 = vst [vmem:[#allocation2 + $0x20] sm:$0xf0] %v1043_v39  ;;  %v1750_v43 = vpack.c.bf16 %v1109_v40, %v1107_v38  ;;  %v1752_v44 = vpack.c.bf16 %v1108_v24, %v1106_v42 }
 0x2b8   : > { %v1075_v25 = vpop.permute.xlu1 %1074  ;;  %1751 = vmatprep.subr.bf16.mxu0 %v1750_v43 }
 0x2b9   : > { %v1080_v32 = vsel %vm715_vm7, %v1075_v25, %v1077_v2  ;;  %1753 = vmatpush1.bf16.msra.mxu0 %v1752_v44  ;;  %v1113_v31 = vld [vmem:[#allocation2 + $0x38] sm:$0xff] }
 0x2ba   : > { %1084 = vst [vmem:[#allocation2 + $0x30] sm:$0xf0] %v1080_v32  ;;  %v1754_v23 = vpack.c.bf16 %v1113_v31, %v1111_v45 }
 0x2bb   : > { %v1114_v52 = vld [vmem:[#allocation2 + $0x40] sm:$0xf] }
 0x2bc   : > { %v1098_v46 = vpop.permute.xlu1 %1097  ;;  %1755 = vmatprep.subr.bf16.mxu0 %v1754_v23 }
 0x2bd   : > { %v1100_v41 = vsel %vm540_vm2, %v1096_v29, %v1098_v46  ;;  %v1110_v47 = vld [vmem:[#allocation2 + $0x20] sm:$0xff] }
 0x2be   : > { %1104 = vst [vmem:[#allocation2 + $0x48] sm:$0xf] %v1100_v41 }
 0x2c1   : > { %v1112_v49 = vld [vmem:[#allocation2 + $0x30] sm:$0xff] }
 0x2c2   : > { %v1756_v61 = vpack.c.bf16 %v1112_v49, %v1110_v47 }
 0x2c3   : > { %v863_v54 = vpop.permute.xlu0 %862 }
 0x2c4   : > { %1757 = vmatpush1.bf16.msra.mxu0 %v1756_v61  ;;  %v935_v62 = vadd.f32 %v2246_v48, %v863_v54  ;;  %v937_v1 = vadd.f32 %v2248_v50, %v863_v54  ;;  %v1284_v48 = vld [vmem:[%s2387_s10] sm:$0xf] }
 0x2c5   : > { %v1115_v63 = vld [vmem:[#allocation2 + $0x48] sm:$0xf]  ;;  %v1285_v50 = vld [vmem:[%s2388_s11] sm:$0xf] }
 0x2c6   : > { %1665 = vmatprep.subr.msk.mxu0 %vm762_vm9, %v1115_v63 }
 0x2c7   : > { %v1453_v27 = vpop.permute.xlu0 %1452 }
 0x2c8   : > { %1666 = vmatpush1.msk.msra.mxu0 %vm762_vm9, %v1114_v52  ;;  %v1458_v28 = vrot.slane %v1453_v27, %v2072_v6 }
 0x2c9   : > { %1667 = vmatmul.mubr.msk.f32.vlgmr.msra.gmra.mrb[2].mxu0 %vm758_vm10, %v1105_v51  ;;  %1724 = vmatprep.subr.mxu0 %v1912_v5 }
 0x2ca   : > { %1726 = vmatprep.mubr.msk.f32.mxu0 %vm1923_vm11, %v1912_v5 }
 0x2cd   : > { %v1200_v53 = vpop.permute.xlu1 %1199 }
 0x2d1   : > { %v1208_v56 = vpop.permute.xlu1 %1207 }
 0x39c   : > { %v1191_v55 = vpop.f32.mrb[2].mxu0 }
 0x39d   : > { %v1202_v58 = vmul.f32 %v1200_v53, %v1191_v55  ;;  %v1193_v59 = vpop.f32.mrb[3].mxu0 }
 0x39e   : > { %v1203_v60 = vmul.f32 %v1200_v53, %v1193_v59 }
 0x39f   : > { %v1210_v0 = vadd.f32 %v1208_v56, %v1202_v58 }
 0x3a0   : > { %v1211_v2 = vadd.f32 %v1208_v56, %v1203_v60 }
 0x3a1   : > { %v2289_v3 = vadd.f32 %v1210_v0, %v935_v62 }
 0x3a2   : > { %v2291_v4 = vadd.f32 %v1211_v2, %v937_v1 }
 0x3a4   : > { %1278 = vmatprep.mubr.f32.mxu1 %v2291_v4 }
 0x3a5   : > { %1279 = vmatmul.mubr.f32.vlgmr.msra.gmra.mrb[2].mxu1 %v2289_v3 }
 0x478   : > { %v1717_v7 = vpop.f32.mrb[2].mxu1 }
 0x479   : > { %v1718_v8 = vpop.f32.mrb[3].mxu1 }
 0x47a   : > { %v1719_v9 = vadd.f32 %v1718_v8, %v1717_v7 }
 0x47c   : > { %1725 = vmatpush3.msk.msra.mxu0 %vm762_vm9, %v1719_v9 }
 0x47d   : > { %1727 = vmatmul.mubr.msk.f32.vlgmr.msra.gmra.mrb[4].mxu0 %vm1286_vm12, %v1284_v48  ;;  %1729 = vmatprep.subr.mxu0 %v1912_v5 }
 0x47e   : > { %1731 = vmatprep.mubr.msk.f32.mxu0 %vm1923_vm11, %v1912_v5 }
 0x550   : > { %v1359_v10 = vpop.f32.mrb[4].mxu0 }
 0x551   : > { %v1360_v11 = vadd.f32 %v1359_v10, %v1285_v50  ;;  %v1728_v12 = vpop.f32.mrb[5].mxu0 }
 0x553   : > { %v1363_v57 = vmax.f32 %v1360_v11, 0.0 }
 0x555   : > { %1730 = vmatpush3.msk.msra.mxu0 %vm762_vm9, %v1363_v57 }
 0x556   : > { %1732 = vmatmul.mubr.msk.f32.vlgmr.msra.gmra.mrb[6].mxu0 %vm1286_vm12, %v1364_v13  ;;  %1673 = vmatprep.subr.msk.mxu0 %vm762_vm9, %v2291_v4 }
 0x557   : > { %1674 = vmatpush1.msk.msra.mxu0 %vm762_vm9, %v2289_v3  ;;  %1532 = vmatprep.mubr.f32.mxu0 %v1912_v5 }
 0x55a   : > { %1675 = vmatmul.mubr.msk.f32.vlgmr.msra.gmra.mrb[8].mxu0 %vm1286_vm12, %v1448_v15 }
 0x629   : > { %v1438_v14 = vpop.f32.mrb[6].mxu0 }
 0x62a   : > { %v1439_v17 = vadd.f32 %v1438_v14, %v1365_v16  ;;  %v1733_v18 = vpop.f32.mrb[7].mxu0 }
 0x62c   : > { %v1672_v19 = vmul.f32 -1.442695, %v1439_v17 }
 0x62d   : > { %v1534_v20 = vpop.f32.mrb[8].mxu0 }
 0x62e   : > { %1834 = vpow2.f32 %v1672_v19  ;;  %v1536_v21 = vpop.f32.mrb[9].mxu0  ;;  %v1535_v29 = vadd.f32 %v1534_v20, %v1458_v28 }
 0x62f   : > { %v1537_v30 = vadd.f32 %v1536_v21, %v1458_v28 }
 0x630   : > { %v1676_v34 = vmul.f32 -1.442695, %v1535_v29 }
 0x631   : > { %v1677_v33 = vmul.f32 -1.442695, %v1537_v30 }
 0x638   : > { %v1835_v22 = vpop.eup %1834 }
 0x639   : > { %v1445_v26 = vadd.f32 1.0, %v1835_v22 }
 0x63b   : > { %1836 = vrcp.f32 %v1445_v26 }
 0x63c   : > { %1838 = vpow2.f32 %v1676_v34 }
 0x63d   : > { %1840 = vpow2.f32 %v1677_v33 }
 0x645   : > { %v1837_v5 = vpop.eup %1836 }
 0x646   : > { %1553 = vperm.xlu1 %1826, %v1837_v5   ;;  %v1839_v35 = vpop.eup %1838 }
 0x647   : > { %v1841_v36 = vpop.eup %1840  ;;  %v1545_v37 = vadd.f32 1.0, %v1839_v35 }
 0x648   : > { %v1546_v38 = vadd.f32 1.0, %v1841_v36 }
 0x649   : > { %1842 = vrcp.f32 %v1545_v37 }
 0x64a   : > { %1844 = vrcp.f32 %v1546_v38 }
 0x653   : > { %v1843_v39 = vpop.eup %1842 }
 0x654   : > { %v1845_v40 = vpop.eup %1844  ;;  %v1561_v42 = vrot.slane %v1843_v39, %v2072_v6 }
 0x655   : > { %v1565_v24 = vrot.slane %v1845_v40, %v2072_v6 }
 0x656   : > { %v1566_v32 = vmul.f32 %v1561_v42, %v2289_v3 }
 0x657   : > { %v1567_v45 = vmul.f32 %v1565_v24, %v2291_v4 }
 0x6c5   : > { %v1554_v43 = vpop.permute.xlu1 %1553 }
 0x6c6   : > { %v1556_v44 = vmul.f32 %v1554_v43, %v2289_v3  ;;  %v1557_v25 = vmul.f32 %v1554_v43, %v2291_v4 }
 0x6c8   : > { %v1568_v31 = vmax.f32 %v1556_v44, %v1566_v32  ;;  %v1569_v23 = vmax.f32 %v1557_v25, %v1567_v45 }
 0x6ca   : > { %v1570_v46 = vmax.f32 %v1568_v31, 0.0  ;;  %v1571_v41 = vmax.f32 %v1569_v23, 0.0 }
 0x6cc   : > { %v1574_v47 = vcombine.low %v1570_v46, %v1571_v41 }
 0x6ce   : > { %1576 = vst [vmem:[%s516_s29] sm:$0xff] %v1574_v47 }
 0x6cf   : > { %1861 = shalt.err (!%p1858_p3)
}
 0x6d0   : > { %s1862_s27 = scalar_lea.hbm %s2335_s30, 128  ;;  %s1866_s22 = scalar_lea.hbm %s2393_s16, 256 }
 0x6d1   : > { %p1863_p4 = scmp.ne.s32.totalorder %s2335_s30, %s1862_s27  ;;  %p1867_p9 = scmp.lt.u32.totalorder %s2335_s30, %s2393_s16 }
 0x6d2   : > { %p1868_p10 = scmp.lt.u32.totalorder %s1866_s22, %s1862_s27  ;;  %p1870_p12 = scmp.lt.u32.totalorder %s1862_s27, %s2335_s30 }
 0x6d3   : > { %p1864_p7 = pnand %p1863_p4, %p2051_p5 }
 0x6d4   : > { %p1869_p11 = por %p1868_p10, %p1867_p9 }
 0x6d5   : > { %p1865_p8 = pneg %p1864_p7 }
 0x6d6   : > { %p1871_p13 = por %p1870_p12, %p1869_p11 }
 0x6d8   : > { %p1872_p0 = pnand %p1871_p13, %p1865_p8 }
 0x6da   : > { %1875 = shalt.err (!%p1872_p0)
}
 0x6db   : > { %1774 = dma.vmem_to_hbm [thread:$0]  (%p2051_p5), %s2337_s1, 128, %s2335_s30, %s1578_s2  }
 0x6dc PF: > { %p1780_p1 = scmp.ge.s32.totalorder %s1910_s26, 2  ;;  %s1604_s3 = sand.u32 1, %s1898_s23  }
 0x6dd   : > { %s1605_s4 = scalar_lea.sflag [#allocation6], %s1604_s3 }
 0x6de   : > { %p1777_p2 = pnand %p1780_p1, %p2055_p6 }
 0x6e0   : > { %1893 = dma.done.wait (!%p1777_p2), %s1605_s4, 128  }
 0x6e1   : > { %1895 = vsyncadd (!%p1777_p2), %s1605_s4, 4294967168  ;;  %p28_p3 = scmp.ge.s32.totalorder %s2038_s28, 4   ;;  %s2421_s23 = smov %s1902_s24 }
 0x6e2   : > { %s2422_s24 = smov %s1906_s25  ;;  %s2423_s25 = smov %s2049_s0 }
 0x6e3   : > { %s2424_s26 = smov %s2038_s28  ;;  %30 = sbr.rel (!%p28_p3) target bundleno = 9 (0x9), region = 120 }
 0x6ea   :  { %1610 = vsyncpa [#allocation6], 1 }
 0x6eb   :  { %1612 = vsyncpa [#allocation6 + $0x1], 1 }

</bundles_post_ra>
